<compile_context>
chip_gen: v6e
topology: v6e:2x2x1
jax: 0.10.0
libtpu: 0.0.40
codegen_flags: <defaults>
</compile_context>

<pallas_src>
import math
import functools

import jax
import jax.numpy as jnp
from jax import lax
from jax.experimental import pallas as pl
from jax.experimental.pallas import tpu as pltpu


_PADC = 8  # zero-column halo width per side; multiple of the sublane tile (8)


# -----------------------------------------------------------------------------
# Pallas kernel
# -----------------------------------------------------------------------------
def _conv3x3_kernel(*refs, tH, H, W, fuse_gn, emit_stats):
    """3x3 conv (stride 1, pad 1) on one (tH, W) row tile, shift-accumulate form.

    Inputs : x (unpadded NHWC, full image resident per batch), w (3,3,Cin,Cout) bf16,
             bias (1,Cout) f32, [GN scale/shift (1,1,Cin) f32 when fuse_gn].
    Outputs: y (1,tH,W,Cout), [per-tile GN partials (1,1,1,Cout) x2 when emit_stats].
    """
    x_ref, w_ref, b_ref = refs[0], refs[1], refs[2]
    i = 3
    if fuse_gn:
        scale_ref, shift_ref = refs[3], refs[4]
        i = 5
    o_ref = refs[i]
    if emit_stats:
        sum_ref, ssq_ref = refs[i + 1], refs[i + 2]

    h = pl.program_id(1)
    row0 = pl.multiple_of(h * tH, tH)
    cin = x_ref.shape[-1]
    cout = o_ref.shape[-1]
    cdtype = jnp.bfloat16

    # --- tile rows plus 1-row halo from the UNPADDED image (no HBM pad copy) ---
    top = x_ref[0, pl.ds(jnp.maximum(row0 - 1, 0), 1), :, :]
    mid = x_ref[0, pl.ds(row0, tH), :, :]
    bot = x_ref[0, pl.ds(jnp.minimum(row0 + tH, H - 1), 1), :, :]

    if fuse_gn:
        scale = scale_ref[0, :, :]          # (1, Cin) f32
        shift = shift_ref[0, :, :]

        def act(v):                         # GroupNorm affine + SiLU, bf16 out for MXU
            v = v.astype(jnp.float32) * scale + shift
            return (v * jax.nn.sigmoid(v)).astype(cdtype)
    else:
        def act(v):                         # keep bf16 end-to-end (no f32 upcast pass)
            return v.astype(cdtype)

    # Zero the halo rows at the image boundary AFTER the activation, so they are
    # exact conv zero-padding (no per-tile iota mask needed).
    top = act(top) * jnp.where(row0 > 0, 1.0, 0.0).astype(cdtype)
    bot = act(bot) * jnp.where(row0 + tH < H, 1.0, 0.0).astype(cdtype)
    rows = jnp.concatenate([top, act(mid), bot], axis=0)            # (tH+2, W, Cin)

    # aligned zero-column halo (8 cols each side keeps the sublane concat aligned)
    zc = jnp.zeros((tH + 2, _PADC, cin), cdtype)
    xw = jnp.concatenate([zc, rows, zc], axis=1)                    # (tH+2, W+16, Cin)

    # bias-initialized f32 accumulator; nine shifted MXU matmuls (bf16 operands).
    acc = jnp.broadcast_to(b_ref[...], (tH * W, cout))
    for kh in range(3):                                             # static unrolled
        for kw in range(3):
            patch = xw[kh:kh + tH, _PADC - 1 + kw:_PADC - 1 + kw + W, :]
            acc = acc + jnp.dot(patch.reshape(tH * W, cin),
                                w_ref[kh, kw, :, :],
                                preferred_element_type=jnp.float32)

    o_ref[0, :, :, :] = acc.reshape(tH, W, cout).astype(o_ref.dtype)

    if emit_stats:
        # fused GroupNorm partial statistics (per-tile, per-channel sums of f32 acc)
        sum_ref[0, 0, :, :] = jnp.sum(acc, axis=0, keepdims=True)
        ssq_ref[0, 0, :, :] = jnp.sum(acc * acc, axis=0, keepdims=True)


# -----------------------------------------------------------------------------
# Pallas wrappers
# -----------------------------------------------------------------------------
def _pick_tile_h(H):
    # Multiples of 8 keep M = tH*W a full MXU pass and sublane-aligned stores.
    if H % 8 == 0:
        return 8
    # TODO(synk): pad H to a multiple of 8 instead of shrinking the tile.
    for t in range(min(H, 8), 0, -1):
        if H % t == 0:
            return t
    return 1


def _vmem_limit_bytes(est_bytes):
    """Per-generation scoped-VMEM limit derived from the actual buffer estimate."""
    try:
        cap = int(pltpu.get_tpu_info().vmem_capacity_bytes)
    except Exception:
        cap = 64 * 1024 * 1024                      # conservative (v7x physical)
    hi = min(max(cap - 16 * 1024 * 1024, 16 * 1024 * 1024), 100 * 1024 * 1024)
    return int(min(hi, max(4 * int(est_bytes), 16 * 1024 * 1024)))


def conv3x3_nhwc(x_nhwc, w_hwio_bf16, bias_row, *, gn_scale=None, gn_shift=None,
                 out_dtype=jnp.float32, emit_stats=False):
    """3x3 conv, stride 1, pad 1; optional fused GroupNorm affine + SiLU on the input
    and optional fused GroupNorm partial statistics of the output.

    x_nhwc: (N,H,W,Cin); w_hwio_bf16: (3,3,Cin,Cout) bf16; bias_row: (1,Cout) f32.
    """
    N, H, W, Cin = x_nhwc.shape
    Cout = w_hwio_bf16.shape[-1]
    fuse_gn = gn_scale is not None
    if W % 8 != 0:
        raise NotImplementedError(
            "W must be a multiple of 8 (aligned halo concat). TODO(synk): pad W.")

    tH = _pick_tile_h(H)
    nH = H // tH

    kernel = functools.partial(_conv3x3_kernel, tH=tH, H=H, W=W,
                               fuse_gn=fuse_gn, emit_stats=emit_stats)

    in_specs = [
        # full UNPADDED image stays resident per batch across the h tiles.
        # TODO(synk): switch to per-tile halo blocks / manual DMA + K,Cout grid tiling
        # once the (missing) down/mid/up blocks bring large H,W and Cin up to ~896.
        pl.BlockSpec((1, H, W, Cin), lambda n, h: (n, 0, 0, 0)),
        pl.BlockSpec((3, 3, Cin, Cout), lambda n, h: (0, 0, 0, 0)),
        pl.BlockSpec((1, Cout), lambda n, h: (0, 0)),
    ]
    args = [x_nhwc, w_hwio_bf16, bias_row]
    if fuse_gn:
        in_specs += [pl.BlockSpec((1, 1, Cin), lambda n, h: (n, 0, 0)),
                     pl.BlockSpec((1, 1, Cin), lambda n, h: (n, 0, 0))]
        args += [gn_scale, gn_shift]

    out_shapes = [jax.ShapeDtypeStruct((N, H, W, Cout), out_dtype)]
    out_specs = [pl.BlockSpec((1, tH, W, Cout), lambda n, h: (n, h, 0, 0))]
    if emit_stats:
        out_shapes += [jax.ShapeDtypeStruct((N, nH, 1, Cout), jnp.float32),
                       jax.ShapeDtypeStruct((N, nH, 1, Cout), jnp.float32)]
        out_specs += [pl.BlockSpec((1, 1, 1, Cout), lambda n, h: (n, h, 0, 0)),
                      pl.BlockSpec((1, 1, 1, Cout), lambda n, h: (n, h, 0, 0))]

    est_bytes = (2 * H * W * Cin * x_nhwc.dtype.itemsize          # resident image x2
                 + 2 * 9 * Cin * Cout * 2 + 2 * Cout * 4          # weights + bias
                 + 2 * tH * W * Cout * jnp.dtype(out_dtype).itemsize
                 + (tH + 2) * (W + 2 * _PADC) * Cin * 2           # in-kernel window
                 + 10 * tH * W * max(Cin, Cout) * 4)              # patches / acc slack

    outs = pl.pallas_call(
        kernel,
        out_shape=tuple(out_shapes),
        grid=(N, nH),
        in_specs=in_specs,
        out_specs=tuple(out_specs),
        compiler_params=pltpu.CompilerParams(
            # shard across TensorCores on the batch axis only, so the per-batch
            # resident image is never duplicated across cores (v7x megacore).
            dimension_semantics=("parallel", "arbitrary"),
            vmem_limit_bytes=_vmem_limit_bytes(est_bytes)),
    )(*args)

    if emit_stats:
        return outs
    return outs[0]


def gn_scale_shift_from_stats(sums, ssqs, gamma, beta, *, num_groups, eps, num_pixels):
    """Finish GroupNorm from the fused per-tile partials -> (scale, shift), (N,1,C)."""
    N = sums.shape[0]
    C = sums.shape[-1]
    cs = C // num_groups
    s = jnp.sum(sums.reshape(N, -1, C), axis=1)                   # (N, C)
    q = jnp.sum(ssqs.reshape(N, -1, C), axis=1)
    gs = jnp.sum(s.reshape(N, num_groups, cs), axis=-1)           # (N, G)
    gq = jnp.sum(q.reshape(N, num_groups, cs), axis=-1)
    cnt = float(num_pixels * cs)
    mean = gs / cnt
    var = jnp.maximum(gq / cnt - mean * mean, 0.0)                # biased variance
    inv = lax.rsqrt(var + eps)
    inv_c = jnp.repeat(inv, cs, axis=1)                           # (N, C)
    mean_c = jnp.repeat(mean, cs, axis=1)
    scale = gamma[None, :] * inv_c
    shift = beta[None, :] - mean_c * scale
    return scale[:, None, :], shift[:, None, :]                   # (N,1,C) each


# -----------------------------------------------------------------------------
# Plain-JAX glue mirroring the PyTorch helpers
# -----------------------------------------------------------------------------
def get_timestep_embedding(timesteps, embedding_dim, downscale_freq_shift=1.0,
                           scale=1.0, max_period=10000):
    half_dim = embedding_dim // 2
    exponent = -math.log(max_period) * jnp.arange(half_dim, dtype=jnp.float32)
    exponent = exponent / (half_dim - downscale_freq_shift)
    emb = jnp.exp(exponent)
    emb = timesteps.astype(jnp.float32)[:, None] * emb[None, :]
    emb = scale * emb
    emb = jnp.concatenate([jnp.sin(emb), jnp.cos(emb)], axis=-1)
    emb = jnp.concatenate([emb[:, half_dim:], emb[:, :half_dim]], axis=-1)
    # embedding_dim (= block_out_channels[0]) is even here -> no pad branch needed
    return emb


# -----------------------------------------------------------------------------
# UNet2DModel (Pallas version)
# -----------------------------------------------------------------------------
class UNet2DModelPallas:
    def __init__(self, *, in_channels=3, out_channels=3, freq_shift=0,
                 block_out_channels=(32, 64, 96, 128), norm_num_groups=8,
                 norm_eps=1e-5, seed=0):
        self.in_channels = in_channels
        self.out_channels = out_channels
        self.freq_shift = float(freq_shift)
        self.norm_num_groups = norm_num_groups
        self.norm_eps = norm_eps
        C0 = block_out_channels[0]
        self.C0 = C0
        self.time_embed_dim = C0 * 4

        key = jax.random.PRNGKey(seed)
        ks = jax.random.split(key, 8)
        init = lambda k, shape: (0.05 * jax.random.normal(k, shape)).astype(jnp.float32)

        # conv_in: Conv2d(in_channels, C0, k=3, pad=1).  OIHW -> HWIO, bf16 for the MXU.
        w_in_oihw = init(ks[0], (C0, in_channels, 3, 3))
        self.w_conv_in = jnp.transpose(w_in_oihw, (2, 3, 1, 0)).astype(jnp.bfloat16)
        self.b_conv_in = init(ks[1], (C0,)).reshape(1, C0)

        # TimestepEmbedding: Linear(C0 -> 4*C0), SiLU, Linear(4*C0 -> 4*C0) -> XLA.
        self.w_lin1 = init(ks[2], (C0, self.time_embed_dim))
        self.b_lin1 = init(ks[3], (self.time_embed_dim,))
        self.w_lin2 = init(ks[4], (self.time_embed_dim, self.time_embed_dim))
        self.b_lin2 = init(ks[5], (self.time_embed_dim,))

        # conv_norm_out: GroupNorm(norm_num_groups, C0) (PyTorch default affine init)
        self.gn_gamma = jnp.ones((C0,), jnp.float32)
        self.gn_beta = jnp.zeros((C0,), jnp.float32)

        # conv_out: Conv2d(C0, out_channels, k=3, pad=1); Cout padded to 128 so the
        # kernel does lane-dense stores (real channels sliced back in __call__).
        self.cout_pad = 128
        w_out_oihw = init(ks[6], (out_channels, C0, 3, 3))
        w_out_hwio = jnp.transpose(w_out_oihw, (2, 3, 1, 0))           # (3,3,C0,out)
        self.w_conv_out = jnp.pad(
            w_out_hwio, ((0, 0), (0, 0), (0, 0), (0, self.cout_pad - out_channels))
        ).astype(jnp.bfloat16)
        b_out = init(ks[7], (out_channels,))
        self.b_conv_out = jnp.pad(
            b_out, (0, self.cout_pad - out_channels)).reshape(1, self.cout_pad)

    def __call__(self, sample_nchw, timestep):
        N, _, H, W = sample_nchw.shape

        # --- timestep embedding (M=2 matmuls; MXU unusable at this shape -> XLA) ---
        timesteps = jnp.full((N,), timestep, dtype=jnp.int32)
        t_emb = get_timestep_embedding(timesteps, self.C0,
                                       downscale_freq_shift=self.freq_shift)
        hmlp = t_emb @ self.w_lin1 + self.b_lin1
        hmlp = hmlp * jax.nn.sigmoid(hmlp)                             # SiLU
        emb = hmlp @ self.w_lin2 + self.b_lin2                         # (N, 4*C0)

        # --- conv_in: Pallas conv, bf16 activation out, fused GroupNorm partials ---
        x = jnp.transpose(sample_nchw, (0, 2, 3, 1))                   # NCHW -> NHWC
        x, gsum, gssq = conv3x3_nhwc(x, self.w_conv_in, self.b_conv_in,
                                     out_dtype=jnp.bfloat16, emit_stats=True)

        # TODO(synk): down_blocks / mid_block / up_blocks are not implementable here:
        # get_down_block / UNetMidBlock2D / get_up_block definitions are not part of
        # the provided source (`emb` would feed their resnet time projections).

        # --- conv_norm_out + conv_act + conv_out, with the GN affine + SiLU fused
        #     into conv_out's input window (normalized activation never hits HBM) ---
        scale, shift = gn_scale_shift_from_stats(
            gsum, gssq, self.gn_gamma, self.gn_beta,
            num_groups=self.norm_num_groups, eps=self.norm_eps, num_pixels=H * W)
        y = conv3x3_nhwc(x, self.w_conv_out, self.b_conv_out,
                         gn_scale=scale, gn_shift=shift, out_dtype=jnp.float32)
        y = y[..., :self.out_channels]                                 # drop pad chans

        # skip_sample is None for the default (non-skip) block types -> no addition.
        out = jnp.transpose(y, (0, 3, 1, 2))                           # NHWC -> NCHW
        return out, emb


# -----------------------------------------------------------------------------
# Pure-JAX f32 reference (same bf16-rounded weights) for a loose numerics check
# -----------------------------------------------------------------------------
def _reference_forward(model, sample_nchw):
    x = jnp.transpose(sample_nchw, (0, 2, 3, 1)).astype(jnp.float32)
    w_in = model.w_conv_in.astype(jnp.float32)
    x = lax.conv_general_dilated(x, w_in, window_strides=(1, 1),
                                 padding=((1, 1), (1, 1)),
                                 dimension_numbers=("NHWC", "HWIO", "NHWC"))
    x = x + model.b_conv_in.reshape(1, 1, 1, -1)
    N, H, W, C = x.shape
    G = model.norm_num_groups
    xg = x.reshape(N, H * W, G, C // G)
    mean = jnp.mean(xg, axis=(1, 3), keepdims=True)
    var = jnp.mean((xg - mean) ** 2, axis=(1, 3), keepdims=True)
    xn = ((xg - mean) * lax.rsqrt(var + model.norm_eps)).reshape(N, H, W, C)
    xn = xn * model.gn_gamma.reshape(1, 1, 1, -1) + model.gn_beta.reshape(1, 1, 1, -1)
    xn = xn * jax.nn.sigmoid(xn)
    w_out = model.w_conv_out.astype(jnp.float32)[..., :model.out_channels]
    y = lax.conv_general_dilated(xn, w_out, window_strides=(1, 1),
                                 padding=((1, 1), (1, 1)),
                                 dimension_numbers=("NHWC", "HWIO", "NHWC"))
    y = y + model.b_conv_out.reshape(1, 1, 1, -1)[..., :model.out_channels]
    return jnp.transpose(y, (0, 3, 1, 2))


# -----------------------------------------------------------------------------
if __name__ == "__main__":
    key = jax.random.PRNGKey(0)
    k_x, _ = jax.random.split(key)

    N, Cin, H, W = 2, 3, 16, 16
    sample = jax.random.normal(k_x, (N, Cin, H, W), dtype=jnp.float32)
    timestep = 7

    model = UNet2DModelPallas(in_channels=3, out_channels=3, freq_shift=0,
                              block_out_channels=(32, 64, 96, 128),
                              norm_num_groups=8, norm_eps=1e-5, seed=0)

    out, emb = model(sample, timestep)
    jax.block_until_ready(out)
    jax.block_until_ready(emb)

    assert out.shape == (N, 3, H, W), out.shape
    assert emb.shape == (N, model.time_embed_dim), emb.shape

    # loose check vs a pure-JAX f32 reference (covers bf16 activation/MXU rounding)
    ref = _reference_forward(model, sample)
    err = float(jnp.max(jnp.abs(out - ref)))
    assert err < 8e-2, f"max abs err vs reference: {err}"

    print("KERNEL_OK")
</pallas_src>

<mosaic_0001>
module attributes {stable_mosaic.version = 11 : i64} {
  func.func @_conv3x3_kernel(%arg0: i32, %arg1: i32, %arg2: memref<1x16x16x3xf32, #tpu.memory_space<vmem>>, %arg3: memref<3x3x3x32xbf16, #tpu.memory_space<vmem>>, %arg4: memref<1x32xf32, #tpu.memory_space<vmem>>, %arg5: memref<1x8x16x32xbf16, #tpu.memory_space<vmem>>, %arg6: memref<1x1x1x32xf32, #tpu.memory_space<vmem>>, %arg7: memref<1x1x1x32xf32, #tpu.memory_space<vmem>>) attributes {dimension_semantics = [#tpu.dimension_semantics<parallel>, #tpu.dimension_semantics<arbitrary>], iteration_bounds = array<i64: 2, 2>, scalar_prefetch = 0 : i64, scratch_operands = 0 : i64, tpu.core_type = #tpu.core_type<tc>, window_params = [{transform_indices = @transform_0, window_bounds = array<i64: 1, 16, 16, 3>}, {pipeline_mode = #tpu.pipeline_mode<synchronous>, transform_indices = @transform_1, window_bounds = array<i64: 3, 3, 3, 32>}, {pipeline_mode = #tpu.pipeline_mode<synchronous>, transform_indices = @transform_2, window_bounds = array<i64: 1, 32>}, {transform_indices = @transform_3, window_bounds = array<i64: 1, 8, 16, 32>}, {transform_indices = @transform_4, window_bounds = array<i64: 1, 1, 1, 32>}, {transform_indices = @transform_5, window_bounds = array<i64: 1, 1, 1, 32>}]} {
    %c8_i32 = arith.constant 8 : i32
    %0 = arith.muli %arg1, %c8_i32 : i32
    %1 = tpu.assume_multiple %0, 8 : i32
    %c1_i32 = arith.constant 1 : i32
    %2 = arith.subi %1, %c1_i32 : i32
    %c0_i32 = arith.constant 0 : i32
    %3 = arith.maxsi %2, %c0_i32 : i32
    %c0 = arith.constant 0 : index
    %4 = arith.index_cast %3 : i32 to index
    %c0_0 = arith.constant 0 : index
    %c0_1 = arith.constant 0 : index
    %5 = vector.load %arg2[%c0, %4, %c0_0, %c0_1] : memref<1x16x16x3xf32, #tpu.memory_space<vmem>>, vector<1x1x16x3xf32>
    %6 = vector.shape_cast %5 : vector<1x1x16x3xf32> to vector<1x16x3xf32>
    %c0_2 = arith.constant 0 : index
    %7 = arith.index_cast %1 : i32 to index
    %c0_3 = arith.constant 0 : index
    %c0_4 = arith.constant 0 : index
    %8 = vector.load %arg2[%c0_2, %7, %c0_3, %c0_4] : memref<1x16x16x3xf32, #tpu.memory_space<vmem>>, vector<1x8x16x3xf32>
    %9 = vector.shape_cast %8 : vector<1x8x16x3xf32> to vector<8x16x3xf32>
    %c8_i32_5 = arith.constant 8 : i32
    %10 = arith.addi %1, %c8_i32_5 : i32
    %c15_i32 = arith.constant 15 : i32
    %11 = arith.minsi %10, %c15_i32 : i32
    %c0_6 = arith.constant 0 : index
    %12 = arith.index_cast %11 : i32 to index
    %c0_7 = arith.constant 0 : index
    %c0_8 = arith.constant 0 : index
    %13 = vector.load %arg2[%c0_6, %12, %c0_7, %c0_8] : memref<1x16x16x3xf32, #tpu.memory_space<vmem>>, vector<1x1x16x3xf32>
    %14 = vector.shape_cast %13 : vector<1x1x16x3xf32> to vector<1x16x3xf32>
    %15 = arith.truncf %6 : vector<1x16x3xf32> to vector<1x16x3xbf16>
    %c0_i32_9 = arith.constant 0 : i32
    %16 = arith.cmpi sgt, %1, %c0_i32_9 : i32
    %cst = arith.constant 1.000000e+00 : f32
    %cst_10 = arith.constant 0.000000e+00 : f32
    %17 = arith.select %16, %cst, %cst_10 : f32
    %18 = arith.truncf %17 : f32 to bf16
    %19 = vector.broadcast %18 : bf16 to vector<1x16x3xbf16>
    %20 = arith.mulf %15, %19 : vector<1x16x3xbf16>
    %21 = arith.truncf %14 : vector<1x16x3xf32> to vector<1x16x3xbf16>
    %c8_i32_11 = arith.constant 8 : i32
    %22 = arith.addi %1, %c8_i32_11 : i32
    %c16_i32 = arith.constant 16 : i32
    %23 = arith.cmpi slt, %22, %c16_i32 : i32
    %cst_12 = arith.constant 1.000000e+00 : f32
    %cst_13 = arith.constant 0.000000e+00 : f32
    %24 = arith.select %23, %cst_12, %cst_13 : f32
    %25 = arith.truncf %24 : f32 to bf16
    %26 = vector.broadcast %25 : bf16 to vector<1x16x3xbf16>
    %27 = arith.mulf %21, %26 : vector<1x16x3xbf16>
    %28 = arith.truncf %9 : vector<8x16x3xf32> to vector<8x16x3xbf16>
    %29 = tpu.concatenate %20, %28, %27 in 0 : vector<1x16x3xbf16>, vector<8x16x3xbf16>, vector<1x16x3xbf16> -> vector<10x16x3xbf16>
    %cst_14 = arith.constant 0.000000e+00 : bf16
    %30 = vector.broadcast %cst_14 : bf16 to vector<10x8x3xbf16>
    %31 = tpu.concatenate %30, %29, %30 in 1 : vector<10x8x3xbf16>, vector<10x16x3xbf16>, vector<10x8x3xbf16> -> vector<10x32x3xbf16>
    %c0_15 = arith.constant 0 : index
    %c0_16 = arith.constant 0 : index
    %32 = vector.load %arg4[%c0_15, %c0_16] : memref<1x32xf32, #tpu.memory_space<vmem>>, vector<1x32xf32>
    %33 = vector.shape_cast %32 : vector<1x32xf32> to vector<1x32xf32>
    %34 = vector.broadcast %33 : vector<1x32xf32> to vector<128x32xf32>
    %35 = vector.extract_strided_slice %31 {offsets = [0, 7, 0], sizes = [8, 16, 3], strides = [1, 1, 1]} : vector<10x32x3xbf16> to vector<8x16x3xbf16>
    %36 = vector.shape_cast %35 : vector<8x16x3xbf16> to vector<128x3xbf16>
    %c0_17 = arith.constant 0 : index
    %c0_18 = arith.constant 0 : index
    %c0_19 = arith.constant 0 : index
    %c0_20 = arith.constant 0 : index
    %37 = vector.load %arg3[%c0_17, %c0_18, %c0_19, %c0_20] : memref<3x3x3x32xbf16, #tpu.memory_space<vmem>>, vector<1x1x3x32xbf16>
    %38 = vector.shape_cast %37 : vector<1x1x3x32xbf16> to vector<3x32xbf16>
    %cst_21 = arith.constant dense<0.000000e+00> : vector<128x32xf32>
    %39 = tpu.matmul %36, %38, %cst_21 {dimension_numbers = #tpu.dot_dimension_numbers<[1], [0], [0], [1], [0, 0, 1, 1], [], []>} : vector<128x3xbf16>, vector<3x32xbf16>, vector<128x32xf32> -> vector<128x32xf32>
    %40 = arith.addf %34, %39 : vector<128x32xf32>
    %41 = vector.extract_strided_slice %31 {offsets = [0, 8, 0], sizes = [8, 16, 3], strides = [1, 1, 1]} : vector<10x32x3xbf16> to vector<8x16x3xbf16>
    %42 = vector.shape_cast %41 : vector<8x16x3xbf16> to vector<128x3xbf16>
    %c0_22 = arith.constant 0 : index
    %c1 = arith.constant 1 : index
    %c0_23 = arith.constant 0 : index
    %c0_24 = arith.constant 0 : index
    %43 = vector.load %arg3[%c0_22, %c1, %c0_23, %c0_24] : memref<3x3x3x32xbf16, #tpu.memory_space<vmem>>, vector<1x1x3x32xbf16>
    %44 = vector.shape_cast %43 : vector<1x1x3x32xbf16> to vector<3x32xbf16>
    %cst_25 = arith.constant dense<0.000000e+00> : vector<128x32xf32>
    %45 = tpu.matmul %42, %44, %cst_25 {dimension_numbers = #tpu.dot_dimension_numbers<[1], [0], [0], [1], [0, 0, 1, 1], [], []>} : vector<128x3xbf16>, vector<3x32xbf16>, vector<128x32xf32> -> vector<128x32xf32>
    %46 = arith.addf %40, %45 : vector<128x32xf32>
    %47 = vector.extract_strided_slice %31 {offsets = [0, 9, 0], sizes = [8, 16, 3], strides = [1, 1, 1]} : vector<10x32x3xbf16> to vector<8x16x3xbf16>
    %48 = vector.shape_cast %47 : vector<8x16x3xbf16> to vector<128x3xbf16>
    %c0_26 = arith.constant 0 : index
    %c2 = arith.constant 2 : index
    %c0_27 = arith.constant 0 : index
    %c0_28 = arith.constant 0 : index
    %49 = vector.load %arg3[%c0_26, %c2, %c0_27, %c0_28] : memref<3x3x3x32xbf16, #tpu.memory_space<vmem>>, vector<1x1x3x32xbf16>
    %50 = vector.shape_cast %49 : vector<1x1x3x32xbf16> to vector<3x32xbf16>
    %cst_29 = arith.constant dense<0.000000e+00> : vector<128x32xf32>
    %51 = tpu.matmul %48, %50, %cst_29 {dimension_numbers = #tpu.dot_dimension_numbers<[1], [0], [0], [1], [0, 0, 1, 1], [], []>} : vector<128x3xbf16>, vector<3x32xbf16>, vector<128x32xf32> -> vector<128x32xf32>
    %52 = arith.addf %46, %51 : vector<128x32xf32>
    %53 = vector.extract_strided_slice %31 {offsets = [1, 7, 0], sizes = [8, 16, 3], strides = [1, 1, 1]} : vector<10x32x3xbf16> to vector<8x16x3xbf16>
    %54 = vector.shape_cast %53 : vector<8x16x3xbf16> to vector<128x3xbf16>
    %c1_30 = arith.constant 1 : index
    %c0_31 = arith.constant 0 : index
    %c0_32 = arith.constant 0 : index
    %c0_33 = arith.constant 0 : index
    %55 = vector.load %arg3[%c1_30, %c0_31, %c0_32, %c0_33] : memref<3x3x3x32xbf16, #tpu.memory_space<vmem>>, vector<1x1x3x32xbf16>
    %56 = vector.shape_cast %55 : vector<1x1x3x32xbf16> to vector<3x32xbf16>
    %cst_34 = arith.constant dense<0.000000e+00> : vector<128x32xf32>
    %57 = tpu.matmul %54, %56, %cst_34 {dimension_numbers = #tpu.dot_dimension_numbers<[1], [0], [0], [1], [0, 0, 1, 1], [], []>} : vector<128x3xbf16>, vector<3x32xbf16>, vector<128x32xf32> -> vector<128x32xf32>
    %58 = arith.addf %52, %57 : vector<128x32xf32>
    %59 = vector.extract_strided_slice %31 {offsets = [1, 8, 0], sizes = [8, 16, 3], strides = [1, 1, 1]} : vector<10x32x3xbf16> to vector<8x16x3xbf16>
    %60 = vector.shape_cast %59 : vector<8x16x3xbf16> to vector<128x3xbf16>
    %c1_35 = arith.constant 1 : index
    %c1_36 = arith.constant 1 : index
    %c0_37 = arith.constant 0 : index
    %c0_38 = arith.constant 0 : index
    %61 = vector.load %arg3[%c1_35, %c1_36, %c0_37, %c0_38] : memref<3x3x3x32xbf16, #tpu.memory_space<vmem>>, vector<1x1x3x32xbf16>
    %62 = vector.shape_cast %61 : vector<1x1x3x32xbf16> to vector<3x32xbf16>
    %cst_39 = arith.constant dense<0.000000e+00> : vector<128x32xf32>
    %63 = tpu.matmul %60, %62, %cst_39 {dimension_numbers = #tpu.dot_dimension_numbers<[1], [0], [0], [1], [0, 0, 1, 1], [], []>} : vector<128x3xbf16>, vector<3x32xbf16>, vector<128x32xf32> -> vector<128x32xf32>
    %64 = arith.addf %58, %63 : vector<128x32xf32>
    %65 = vector.extract_strided_slice %31 {offsets = [1, 9, 0], sizes = [8, 16, 3], strides = [1, 1, 1]} : vector<10x32x3xbf16> to vector<8x16x3xbf16>
    %66 = vector.shape_cast %65 : vector<8x16x3xbf16> to vector<128x3xbf16>
    %c1_40 = arith.constant 1 : index
    %c2_41 = arith.constant 2 : index
    %c0_42 = arith.constant 0 : index
    %c0_43 = arith.constant 0 : index
    %67 = vector.load %arg3[%c1_40, %c2_41, %c0_42, %c0_43] : memref<3x3x3x32xbf16, #tpu.memory_space<vmem>>, vector<1x1x3x32xbf16>
    %68 = vector.shape_cast %67 : vector<1x1x3x32xbf16> to vector<3x32xbf16>
    %cst_44 = arith.constant dense<0.000000e+00> : vector<128x32xf32>
    %69 = tpu.matmul %66, %68, %cst_44 {dimension_numbers = #tpu.dot_dimension_numbers<[1], [0], [0], [1], [0, 0, 1, 1], [], []>} : vector<128x3xbf16>, vector<3x32xbf16>, vector<128x32xf32> -> vector<128x32xf32>
    %70 = arith.addf %64, %69 : vector<128x32xf32>
    %71 = vector.extract_strided_slice %31 {offsets = [2, 7, 0], sizes = [8, 16, 3], strides = [1, 1, 1]} : vector<10x32x3xbf16> to vector<8x16x3xbf16>
    %72 = vector.shape_cast %71 : vector<8x16x3xbf16> to vector<128x3xbf16>
    %c2_45 = arith.constant 2 : index
    %c0_46 = arith.constant 0 : index
    %c0_47 = arith.constant 0 : index
    %c0_48 = arith.constant 0 : index
    %73 = vector.load %arg3[%c2_45, %c0_46, %c0_47, %c0_48] : memref<3x3x3x32xbf16, #tpu.memory_space<vmem>>, vector<1x1x3x32xbf16>
    %74 = vector.shape_cast %73 : vector<1x1x3x32xbf16> to vector<3x32xbf16>
    %cst_49 = arith.constant dense<0.000000e+00> : vector<128x32xf32>
    %75 = tpu.matmul %72, %74, %cst_49 {dimension_numbers = #tpu.dot_dimension_numbers<[1], [0], [0], [1], [0, 0, 1, 1], [], []>} : vector<128x3xbf16>, vector<3x32xbf16>, vector<128x32xf32> -> vector<128x32xf32>
    %76 = arith.addf %70, %75 : vector<128x32xf32>
    %77 = vector.extract_strided_slice %31 {offsets = [2, 8, 0], sizes = [8, 16, 3], strides = [1, 1, 1]} : vector<10x32x3xbf16> to vector<8x16x3xbf16>
    %78 = vector.shape_cast %77 : vector<8x16x3xbf16> to vector<128x3xbf16>
    %c2_50 = arith.constant 2 : index
    %c1_51 = arith.constant 1 : index
    %c0_52 = arith.constant 0 : index
    %c0_53 = arith.constant 0 : index
    %79 = vector.load %arg3[%c2_50, %c1_51, %c0_52, %c0_53] : memref<3x3x3x32xbf16, #tpu.memory_space<vmem>>, vector<1x1x3x32xbf16>
    %80 = vector.shape_cast %79 : vector<1x1x3x32xbf16> to vector<3x32xbf16>
    %cst_54 = arith.constant dense<0.000000e+00> : vector<128x32xf32>
    %81 = tpu.matmul %78, %80, %cst_54 {dimension_numbers = #tpu.dot_dimension_numbers<[1], [0], [0], [1], [0, 0, 1, 1], [], []>} : vector<128x3xbf16>, vector<3x32xbf16>, vector<128x32xf32> -> vector<128x32xf32>
    %82 = arith.addf %76, %81 : vector<128x32xf32>
    %83 = vector.extract_strided_slice %31 {offsets = [2, 9, 0], sizes = [8, 16, 3], strides = [1, 1, 1]} : vector<10x32x3xbf16> to vector<8x16x3xbf16>
    %84 = vector.shape_cast %83 : vector<8x16x3xbf16> to vector<128x3xbf16>
    %c2_55 = arith.constant 2 : index
    %c2_56 = arith.constant 2 : index
    %c0_57 = arith.constant 0 : index
    %c0_58 = arith.constant 0 : index
    %85 = vector.load %arg3[%c2_55, %c2_56, %c0_57, %c0_58] : memref<3x3x3x32xbf16, #tpu.memory_space<vmem>>, vector<1x1x3x32xbf16>
    %86 = vector.shape_cast %85 : vector<1x1x3x32xbf16> to vector<3x32xbf16>
    %cst_59 = arith.constant dense<0.000000e+00> : vector<128x32xf32>
    %87 = tpu.matmul %84, %86, %cst_59 {dimension_numbers = #tpu.dot_dimension_numbers<[1], [0], [0], [1], [0, 0, 1, 1], [], []>} : vector<128x3xbf16>, vector<3x32xbf16>, vector<128x32xf32> -> vector<128x32xf32>
    %88 = arith.addf %82, %87 : vector<128x32xf32>
    %89 = vector.shape_cast %88 : vector<128x32xf32> to vector<8x16x32xf32>
    %90 = arith.truncf %89 : vector<8x16x32xf32> to vector<8x16x32xbf16>
    %c0_60 = arith.constant 0 : index
    %c0_61 = arith.constant 0 : index
    %c0_62 = arith.constant 0 : index
    %c0_63 = arith.constant 0 : index
    %91 = vector.load %arg5[%c0_60, %c0_61, %c0_62, %c0_63] : memref<1x8x16x32xbf16, #tpu.memory_space<vmem>>, vector<1x8x16x32xbf16>
    %92 = vector.shape_cast %91 : vector<1x8x16x32xbf16> to vector<8x16x32xbf16>
    %93 = vector.shape_cast %90 : vector<8x16x32xbf16> to vector<1x8x16x32xbf16>
    tpu.vector_store %arg5[%c0_60, %c0_61, %c0_62, %c0_63], %93 {strides = array<i32>} : memref<1x8x16x32xbf16, #tpu.memory_space<vmem>>, vector<1x8x16x32xbf16>,
    %cst_64 = arith.constant dense<0.000000e+00> : vector<32xf32>
    %94 = vector.multi_reduction <add>, %88, %cst_64 [0] : vector<128x32xf32> to vector<32xf32>
    %95 = vector.shape_cast %94 : vector<32xf32> to vector<1x32xf32>
    %c0_65 = arith.constant 0 : index
    %c0_66 = arith.constant 0 : index
    %c0_67 = arith.constant 0 : index
    %c0_68 = arith.constant 0 : index
    %96 = vector.load %arg6[%c0_65, %c0_66, %c0_67, %c0_68] : memref<1x1x1x32xf32, #tpu.memory_space<vmem>>, vector<1x1x1x32xf32>
    %97 = vector.shape_cast %96 : vector<1x1x1x32xf32> to vector<1x32xf32>
    %98 = vector.shape_cast %95 : vector<1x32xf32> to vector<1x1x1x32xf32>
    tpu.vector_store %arg6[%c0_65, %c0_66, %c0_67, %c0_68], %98 {strides = array<i32>} : memref<1x1x1x32xf32, #tpu.memory_space<vmem>>, vector<1x1x1x32xf32>,
    %99 = arith.mulf %88, %88 : vector<128x32xf32>
    %cst_69 = arith.constant dense<0.000000e+00> : vector<32xf32>
    %100 = vector.multi_reduction <add>, %99, %cst_69 [0] : vector<128x32xf32> to vector<32xf32>
    %101 = vector.shape_cast %100 : vector<32xf32> to vector<1x32xf32>
    %c0_70 = arith.constant 0 : index
    %c0_71 = arith.constant 0 : index
    %c0_72 = arith.constant 0 : index
    %c0_73 = arith.constant 0 : index
    %102 = vector.load %arg7[%c0_70, %c0_71, %c0_72, %c0_73] : memref<1x1x1x32xf32, #tpu.memory_space<vmem>>, vector<1x1x1x32xf32>
    %103 = vector.shape_cast %102 : vector<1x1x1x32xf32> to vector<1x32xf32>
    %104 = vector.shape_cast %101 : vector<1x32xf32> to vector<1x1x1x32xf32>
    tpu.vector_store %arg7[%c0_70, %c0_71, %c0_72, %c0_73], %104 {strides = array<i32>} : memref<1x1x1x32xf32, #tpu.memory_space<vmem>>, vector<1x1x1x32xf32>,
    return
  }
  func.func @transform_0(%arg0: i32, %arg1: i32) -> (i32, i32, i32, i32) {
    %c0_i32 = arith.constant 0 : i32
    %c0_i32_0 = arith.constant 0 : i32
    %c0_i32_1 = arith.constant 0 : i32
    %c0_i32_2 = arith.constant 0 : i32
    return %arg0, %c0_i32, %c0_i32_0, %c0_i32_1 : i32, i32, i32, i32
  }
  func.func @transform_1(%arg0: i32, %arg1: i32) -> (i32, i32, i32, i32) {
    %c0_i32 = arith.constant 0 : i32
    %c0_i32_0 = arith.constant 0 : i32
    %c0_i32_1 = arith.constant 0 : i32
    %c0_i32_2 = arith.constant 0 : i32
    %c0_i32_3 = arith.constant 0 : i32
    return %c0_i32, %c0_i32_0, %c0_i32_1, %c0_i32_2 : i32, i32, i32, i32
  }
  func.func @transform_2(%arg0: i32, %arg1: i32) -> (i32, i32) {
    %c0_i32 = arith.constant 0 : i32
    %c0_i32_0 = arith.constant 0 : i32
    %c0_i32_1 = arith.constant 0 : i32
    return %c0_i32, %c0_i32_0 : i32, i32
  }
  func.func @transform_3(%arg0: i32, %arg1: i32) -> (i32, i32, i32, i32) {
    %c0_i32 = arith.constant 0 : i32
    %c0_i32_0 = arith.constant 0 : i32
    %c0_i32_1 = arith.constant 0 : i32
    return %arg0, %arg1, %c0_i32, %c0_i32_0 : i32, i32, i32, i32
  }
  func.func @transform_4(%arg0: i32, %arg1: i32) -> (i32, i32, i32, i32) {
    %c0_i32 = arith.constant 0 : i32
    %c0_i32_0 = arith.constant 0 : i32
    %c0_i32_1 = arith.constant 0 : i32
    return %arg0, %arg1, %c0_i32, %c0_i32_0 : i32, i32, i32, i32
  }
  func.func @transform_5(%arg0: i32, %arg1: i32) -> (i32, i32, i32, i32) {
    %c0_i32 = arith.constant 0 : i32
    %c0_i32_0 = arith.constant 0 : i32
    %c0_i32_1 = arith.constant 0 : i32
    return %arg0, %arg1, %c0_i32, %c0_i32_0 : i32, i32, i32, i32
  }
}

</mosaic_0001>

<bundles_post_ra>
// kernel: tpu_custom_call.1
= control target key start
LH: loop header
LB: loop body
LE: loop exit
PB: predicated region body
PF: predicated region fallthrough
CT: control target
= control target key end

     0   :  { %s3954_s0 = inlined_call_operand.vmem [shape: f32[2,16,16,3], index: 0, kind: input, shape index: {}]   ;;  %s3955_s1 = inlined_call_operand.vmem [shape: bf16[3,3,3,32], index: 1, kind: input, shape index: {}]   ;;  %s3956_s2 = inlined_call_operand.vmem [shape: f32[1,32], index: 2, kind: input, shape index: {}]   ;;  %s3957_s3 = inlined_call_operand.hbm [shape: bf16[2,16,16,32], index: 3, kind: output, shape index: {0}]   ;;  %s3958_s4 = inlined_call_operand.hbm [shape: f32[2,2,1,32], index: 4, kind: output, shape index: {1}]   ;;  %s3959_s5 = inlined_call_operand.hbm [shape: f32[2,2,1,32], index: 5, kind: output, shape index: {2}]  }
   0x1   :  { %3970 = sst [smem:[#allocation31_spill]] %s3954_s0 }
   0x2   :  { %11 = vsyncpa [#allocation3], 0 }
   0x3   :  { %13 = vsyncpa [#allocation3 + $0x1], 0 }
   0x4   :  { %14 = vsyncpa [#allocation5], 0 }
   0x5   :  { %16 = vsyncpa [#allocation5 + $0x1], 0  ;;  %s2848_s18 = smov 0   ;;  %s2850_s19 = smov 0  }
   0x6   :  { %s2852_s20 = smov 0   ;;  %s2854_s21 = smov 0  }
   0x7   :  { %s2856_s22 = smov 0   ;;  %s2858_s23 = smov 0  }
   0x8   :  { %s2860_s24 = smov 0   ;;  %s2862_s25 = smov 0  }
   0x9 LB: > { %s3968_s26 = sadd.s32 4294967295, %s2810_s25   ;;  %s3967_s27 = sadd.s32 4294967294, %s2810_s25   ;;  %s2810_s25 = sphi %s2862_s25, %s22_s25   ;;  %s2806_s24 = sphi %s2860_s24, %s4036_s24   ;;  %s2802_s23 = sphi %s2858_s23, %s4035_s23   ;;  %s2798_s22 = sphi %s2856_s22, %s4034_s22   ;;  %s2794_s21 = sphi %s2854_s21, %s4033_s21   ;;  %s2790_s20 = sphi %s2852_s20, %s4032_s20   ;;  %s2786_s19 = sphi %s2850_s19, %s4031_s19   ;;  %s2782_s18 = sphi %s2848_s18, %s4030_s18  }
   0xa   : > { %s31_s28 = sadd.s32 1, %s2802_s23  ;;  %s34_s29 = sadd.s32 1, %s2806_s24 }
   0xb   : > { %p32_p0 = scmp.ge.s32.totalorder %s31_s28, 2  ;;  %p121_p1 = scmp.ne.s32.totalorder %s2790_s20, %s2786_s19 }
   0xc   : > { %p122_p2 = scmp.eq.s32.totalorder %s3968_s26, 3  ;;  %p127_p5 = scmp.ne.s32.totalorder %s2786_s19, %s2782_s18 }
   0xd   : > { %s4038_s28 = smov (%p32_p0, %s31_s28), 0  ;;  %s4040_s29 = smov (!%p32_p0, %s34_s29), %s2806_s24 }
   0xe   : > { %s107_s30 = ssub.s32 %s2802_s23, %s4038_s28  ;;  %p2901_p3 = por %p122_p2, %p121_p1 }
   0xf   : > { %p36_p4 = scmp.ge.s32.totalorder %s4040_s29, 2  ;;  %p128_p6 = scmp.eq.s32.totalorder %s3967_s27, 3 }
  0x10   : > { %p2197_p7 = scmp.ge.s32.totalorder %s2810_s25, 1  ;;  %p216_p9 = scmp.lt.s32.totalorder %s2810_s25, 5 }
  0x11   : > { %s4042_s29 = smov (%p36_p4, %s4040_s29), 0  ;;  %p2912_p8 = por %p128_p6, %p127_p5 }
  0x12   : > { %s106_s8 = ssub.s32 %s2806_s24, %s4042_s29  ;;  %s111_s9 = sadd.s32 1, %s2790_s20 }
  0x13   : > { %s108_s10 = sor.u32 %s107_s30, %s106_s8  ;;  %p217_p10 = pnand %p2197_p7, %p216_p9 }
  0x14   : > { %p109_p11 = scmp.eq.s32.totalorder %s108_s10, 0 }
  0x15   : > { %220 = sbr.rel (%p217_p10) target bundleno = 472 (0x1d8), region = 32 }
  0x16   : > { %s2921_s11 = scalar_select %p109_p11, %s2790_s20, %s111_s9  }
  0x1a   : > { %v516_v0 = vld [vmem:[%s3955_s1] sm:$0x3]  ;;  %vm542_vm0 = vcmask 1040384   ;;  %vm543_vm1 = vcmask 1041408   ;;  %p252_p12 = scmp.lt.s32.totalorder %s2798_s22, 1  ;;  %v2812_v1 = vmov 65535  }
  0x1b   : > { %v544_v2 = vsel %vm542_vm0, 4294967295, %v2812_v1  ;;  %v2215_v4 = vld [vmem:[%s3955_s1 + $0x2] sm:$0x3]  ;;  %v2224_v5 = vld [vmem:[%s3955_s1 + $0x4] sm:$0x3]  ;;  %s2315_s8 = sshll.u32 %s2794_s21, 7 }
  0x1c   : > { %v2927_v3 = vsel %vm543_vm1, %v544_v2, 0  ;;  %s253_s14 = scalar_select %p252_p12, %s2798_s22, 1  ;;  %v2233_v9 = vld [vmem:[%s3955_s1 + $0x6] sm:$0x3]  ;;  %v2242_v10 = vld [vmem:[%s3955_s1 + $0x8] sm:$0x3] }
  0x1d   : > { %v547_v6 = vand.u32 %v2927_v3, %v516_v0  ;;  %v2939_v7 = vand.u32 %v2215_v4, %v2927_v3  ;;  %s2942_s9 = sshll.u32 %s2794_s21, 3  ;;  %v2945_v8 = vand.u32 %v2224_v5, %v2927_v3  ;;  %s3973_s0 = sld [smem:[#allocation31_spill]]  ;;  %vm356_vm2 = vcmask 1043456  }
  0x1e   : > { %s2314_s10 = sshll.u32 %s253_s14, 8  ;;  %s2202_s12 = sadd.s32 4294967295, %s2942_s9  ;;  %vm395_vm3 = vsmask.f32 4352  ;;  %vm517_vm4 = vcmask 23552   ;;  %v2983_v26 = vand.u32 %v2233_v9, %v2927_v3  ;;  %v2993_v32 = vand.u32 %v2242_v10, %v2927_v3 }
  0x1f   : > { %2576 = vmatprep.subr.bf16.mxu1 %v547_v6  ;;  %2414 = vmatprep.subr.bf16.mxu0 %v547_v6  ;;  %p261_p13 = scmp.gt.s32.totalorder %s2202_s12, 0  ;;  %p293_p0 = scmp.gt.s32.totalorder %s2942_s9, 0  ;;  %vm845_vm5 = vsmask.f32 3328  ;;  %vm1888_vm6 = vcmask 257024   ;;  %vm1905_vm7 = vcmask 261120  }
  0x20   : > { %2577 = vmatpush3.bf16.msra.mxu1 %v547_v6  ;;  %2415 = vmatpush3.bf16.msra.mxu0 %v547_v6  ;;  %s3010_s13 = sadd.s32 8, %s2942_s9 }
  0x21   : > { %2432 = vmatprep.subr.bf16.mxu1 %v2939_v7  ;;  %s4044_s12 = smov (!%p261_p13, %s2202_s12), 0  ;;  %2450 = vmatprep.subr.bf16.mxu0 %v2945_v8  ;;  %p286_p2 = scmp.lt.s32.totalorder %s3010_s13, 15 }
  0x22   : > { %s2203_s15 = sshll.u32 %s4044_s12, 4  ;;  %p311_p4 = scmp.lt.s32.totalorder %s3010_s13, 16 }
  0x23   : > { %s2951_s16 = scalar_lea.vmem %s3973_s0, %s2314_s10 }
  0x24   : > { %s2954_s17 = scalar_lea.vmem %s2951_s16, %s2315_s8  ;;  %s264_s14 = scalar_lea.vmem %s2951_s16, %s2203_s15 }
  0x25   : > { %v275_v11 = vld [vmem:[%s2954_s17 + $0x30] sm:$0xff]  ;;  %v276_v12 = vld [vmem:[%s2954_s17 + $0x38] sm:$0xff]  ;;  %v277_v13 = vld [vmem:[%s2954_s17 + $0x40] sm:$0xff]  ;;  %s2969_s8 = scalar_select %p293_p0, 1.0, 0.0 }
  0x26   : > { %v331_v14 = vpack.c.bf16 %v276_v12, %v275_v11  ;;  %v278_v15 = vld [vmem:[%s2954_s17 + $0x48] sm:$0xff]  ;;  %v279_v16 = vld [vmem:[%s2954_s17 + $0x50] sm:$0xff]  ;;  %v280_v17 = vld [vmem:[%s2954_s17 + $0x58] sm:$0xff] }
  0x27   : > { %v332_v18 = vpack.c.bf16 %v278_v15, %v277_v13  ;;  %v333_v19 = vpack.c.bf16 %v280_v17, %v279_v16  ;;  %v269_v20 = vld [vmem:[%s2954_s17] sm:$0xff]  ;;  %v270_v21 = vld [vmem:[%s2954_s17 + $0x8] sm:$0xff]  ;;  %s297_s12 = sshrl.u32 %s2969_s8, 16  ;;  %p296_p1 = scmp.ne.f32.partialorder %s2969_s8, %s2969_s8  ;;  %v271_v6 = vld [vmem:[%s2954_s17 + $0x10] sm:$0xff] }
  0x28   : > { %v2976_v22 = vld [vmem:[%s2954_s17 + $0x60] sm:$0xff]  ;;  %v350_v23 = vrot.slane %v331_v14, 4  ;;  %v328_v24 = vpack.c.bf16 %v270_v21, %v269_v20  ;;  %v2980_v25 = vld [vmem:[%s2954_s17 + $0x68] sm:$0xff]  ;;  %s298_s30 = sand.u32 1, %s297_s12  ;;  %v272_v9 = vld [vmem:[%s2954_s17 + $0x18] sm:$0xff] }
  0x29   : > { %v351_v27 = vrot.slane %v332_v18, 4  ;;  %v2985_v28 = vld [vmem:[%s264_s14] sm:$0xff]  ;;  %v2987_v29 = vld [vmem:[%s264_s14 + $0x8] sm:$0xff]  ;;  %v352_v30 = vrot.slane %v333_v19, 4  ;;  %v334_v31 = vpack.c.bf16 %v2980_v25, %v2976_v22  ;;  %s299_s10 = sadd.s32 32767, %s298_s30  ;;  %v329_v21 = vpack.c.bf16 %v272_v9, %v271_v6 }
  0x2a   : > { %v2996_v33 = vsel %vm356_vm2, 0, %v350_v23  ;;  %v2999_v34 = vsel %vm356_vm2, %v350_v23, 0  ;;  %v292_v35 = vpack.c.bf16 %v2987_v29, %v2985_v28  ;;  %v347_v36 = vrot.slane %v328_v24, 4  ;;  %s300_s15 = sadd.s32 %s299_s10, %s2969_s8 }
  0x2b   : > { %v456_v37 = vshrl.u32 %v2996_v33, 16  ;;  %v459_v38 = vshll.u32 %v2996_v33, 16  ;;  %v463_v39 = vshrl.u32 %v2999_v34, 16  ;;  %v466_v40 = vshll.u32 %v2999_v34, 16  ;;  %s301_s9 = sand.u32 4294901760, %s300_s15 }
  0x2c   : > { %v3013_v41 = vsel %vm356_vm2, 0, %v351_v27  ;;  %v3016_v42 = vsel %vm356_vm2, %v351_v27, 0  ;;  %v3020_v43 = vsel %vm356_vm2, 0, %v352_v30  ;;  %v3023_v44 = vsel %vm356_vm2, %v352_v30, 0  ;;  %s4046_s9 = smov (%p296_p1, %s301_s9), 2143289344 }
  0x2d   : > { %v458_v45 = vrot.slane %v456_v37, 3  ;;  %v461_v46 = vrot.slane %v459_v38, 4  ;;  %v465_v47 = vrot.slane %v463_v39, 3  ;;  %v468_v48 = vrot.slane %v466_v40, 4  ;;  %s287_s14 = scalar_select %p286_p2, %s3010_s13, 15 }
  0x2e   : > { %v471_v49 = vshrl.u32 %v3013_v41, 16  ;;  %v474_v50 = vshll.u32 %v3013_v41, 16  ;;  %v478_v51 = vshrl.u32 %v3016_v42, 16  ;;  %v481_v52 = vshll.u32 %v3016_v42, 16  ;;  %s304_s8 = sshrl.u32 %s4046_s9, 16 }
  0x2f   : > { %v462_v53 = vor.u32 %v461_v46, %v458_v45  ;;  %v469_v54 = vor.u32 %v468_v48, %v465_v47  ;;  %v486_v55 = vshrl.u32 %v3020_v43, 16  ;;  %v3966_v56 = vshll.u32 %v3020_v43, 16  ;;  %s305_s12 = sshll.u32 %s304_s8, 16  ;;  %s2205_s30 = sshll.u32 %s287_s14, 4 }
  0x30   : > { %v473_v57 = vrot.slane %v471_v49, 3  ;;  %v476_v58 = vrot.slane %v474_v50, 4  ;;  %v480_v59 = vrot.slane %v478_v51, 3  ;;  %v483_v60 = vrot.slane %v481_v52, 4  ;;  %s306_s10 = sor.u32 %s305_s12, %s304_s8  ;;  %s3071_s15 = scalar_lea.vmem %s2951_s16, %s2205_s30 }
  0x31   : > { %v3055_v61 = vsel %vm395_vm3, %v462_v53, %v469_v54  ;;  %v488_v62 = vrot.slane %v486_v55, 3  ;;  %v491_v63 = vrot.slane %v3966_v56, 4  ;;  %v3965_v0 = vshrl.u32 %v3023_v44, 16  ;;  %s3123_s16 = scalar_select %p311_p4, 1.0, 0.0 }
  0x32   : > { %2424 = vmatprep.mubr.msk.bf16.mxu1 %vm517_vm4, %v3055_v61  ;;  %v477_v1 = vor.u32 %v476_v58, %v473_v57  ;;  %v484_v2 = vor.u32 %v483_v60, %v480_v59  ;;  %v3964_v4 = vshll.u32 %v3023_v44, 16  ;;  %v3066_v5 = vsel %vm356_vm2, 0, %v347_v36 }
  0x33   : > { %v307_v10 = vstv %s306_s10  ;;  %v492_v11 = vor.u32 %v491_v63, %v488_v62  ;;  %v495_v12 = vrot.slane %v3965_v0, 3  ;;  %v3076_v13 = vsel %vm356_vm2, %v347_v36, 0  ;;  %s315_s13 = sshrl.u32 %s3123_s16, 16  ;;  %p314_p5 = scmp.ne.f32.partialorder %s3123_s16, %s3123_s16 }
  0x34   : > { %v3079_v14 = vsel %vm395_vm3, %v477_v1, %v484_v2  ;;  %v309_v15 = vmul.bf16 %v307_v10, %v292_v35  ;;  %v498_v16 = vrot.slane %v3964_v4, 4  ;;  %v411_v17 = vshrl.u32 %v3066_v5, 16  ;;  %s3169_s9 = sand.u32 1, %s315_s13 }
  0x35   : > { %2425 = vmatmul.mubr.msk.bf16.vlgmr.msra.gmra.mxu1 %vm517_vm4, %v3079_v14  ;;  %v414_v18 = vshll.u32 %v3066_v5, 16  ;;  %v418_v19 = vshrl.u32 %v3076_v13, 16  ;;  %v421_v20 = vshll.u32 %v3076_v13, 16  ;;  %v353_v28 = vrot.slane %v334_v31, 4  ;;  %s317_s14 = sadd.s32 32767, %s3169_s9  ;;  %s3689_s9 = sand.u32 1, %s2786_s19  }
  0x36   : > { %2433 = vmatpush3.bf16.msra.mxu1 %v2939_v7  ;;  %v346_v23 = vrot.slane %v309_v15, 4  ;;  %v499_v24 = vor.u32 %v498_v16, %v495_v12  ;;  %v413_v27 = vrot.slane %v411_v17, 3  ;;  %v3096_v36 = vrot.slane %v411_v17, 4  ;;  %v273_v16 = vld [vmem:[%s2954_s17 + $0x20] sm:$0xff]  ;;  %v274_v17 = vld [vmem:[%s2954_s17 + $0x28] sm:$0xff]  ;;  %s3200_s30 = sadd.s32 %s317_s14, %s3123_s16 }
  0x37   : > { %v416_v29 = vrot.slane %v414_v18, 4  ;;  %v420_v30 = vrot.slane %v418_v19, 3  ;;  %v423_v35 = vrot.slane %v421_v20, 4  ;;  %2468 = vmatprep.subr.bf16.mxu1 %v2983_v26  ;;  %v3108_v25 = vrot.slane %v414_v18, 5  ;;  %s319_s10 = sand.u32 4294901760, %s3200_s30 }
  0x38   : > { %v3100_v7 = vsel %vm356_vm2, 0, %v346_v23  ;;  %v3103_v45 = vsel %vm356_vm2, %v346_v23, 0  ;;  %v3106_v22 = vsel %vm395_vm3, %v492_v11, %v499_v24  ;;  %v3116_v57 = vrot.slane %v418_v19, 4  ;;  %s4048_s10 = smov (%p314_p5, %s319_s10), 2143289344 }
  0x39   : > { %v396_v31 = vshrl.u32 %v3100_v7, 16  ;;  %v399_v46 = vshll.u32 %v3100_v7, 16  ;;  %v403_v47 = vshrl.u32 %v3103_v45, 16  ;;  %v406_v48 = vshll.u32 %v3103_v45, 16  ;;  %2428 = vmatprep.mubr.msk.bf16.mxu1 %vm517_vm4, %v3106_v22  ;;  %s322_s16 = sshrl.u32 %s4048_s10, 16 }
  0x3a   : > { %v417_v53 = vor.u32 %v416_v29, %v413_v27  ;;  %v424_v54 = vor.u32 %v423_v35, %v420_v30  ;;  %v3119_v58 = vsel %vm356_vm2, 0, %v353_v28  ;;  %v3137_v2 = vsel %vm356_vm2, %v353_v28, 0  ;;  %s323_s14 = sshll.u32 %s322_s16, 16 }
  0x3b   : > { %v398_v59 = vrot.slane %v396_v31, 3  ;;  %v401_v60 = vrot.slane %v399_v46, 4  ;;  %v405_v62 = vrot.slane %v403_v47, 3  ;;  %v408_v63 = vrot.slane %v406_v48, 4 }
  0x3c   : > { %v3134_v1 = vsel %vm395_vm3, %v417_v53, %v424_v54  ;;  %v3963_v6 = vshrl.u32 %v3119_v58, 16  ;;  %v3962_v9 = vshll.u32 %v3119_v58, 16  ;;  %v3961_v12 = vshrl.u32 %v3137_v2, 16 }
  0x3d   : > { %v402_v10 = vor.u32 %v401_v60, %v398_v59  ;;  %v409_v11 = vor.u32 %v408_v63, %v405_v62  ;;  %v3960_v15 = vshll.u32 %v3137_v2, 16  ;;  %v348_v23 = vrot.slane %v329_v21, 4 }
  0x3e   : > { %v503_v18 = vrot.slane %v3963_v6, 3  ;;  %v506_v19 = vrot.slane %v3962_v9, 4  ;;  %v679_v24 = vrot.slane %v3100_v7, 4  ;;  %v510_v28 = vrot.slane %v3961_v12, 3 }
  0x3f   : > { %v410_v27 = vsel %vm395_vm3, %v402_v10, %v409_v11  ;;  %v513_v29 = vrot.slane %v3960_v15, 4  ;;  %v680_v30 = vrot.slane %v3103_v45, 4  ;;  %v3159_v53 = vsel %vm356_vm2, 0, %v348_v23 }
  0x40   : > { %2416 = vmatprep.mubr.msk.bf16.mxu0 %vm517_vm4, %v410_v27  ;;  %v507_v35 = vor.u32 %v506_v19, %v503_v18  ;;  %v3162_v21 = vsel %vm356_vm2, %v348_v23, 0  ;;  %v330_v54 = vpack.c.bf16 %v274_v17, %v273_v16  ;;  %v426_v60 = vshrl.u32 %v3159_v53, 16 }
  0x41   : > { %2417 = vmatmul.mubr.msk.bf16.vlgmr.msra.gmra.mxu0 %vm517_vm4, %v3134_v1  ;;  %v514_v59 = vor.u32 %v513_v29, %v510_v28  ;;  %v429_v62 = vshll.u32 %v3159_v53, 16  ;;  %v433_v63 = vshrl.u32 %v3162_v21, 16  ;;  %v436_v10 = vshll.u32 %v3162_v21, 16 }
  0x42   : > { %2451 = vmatpush3.bf16.msra.mxu0 %v2945_v8  ;;  %v681_v11 = vsel %vm356_vm2, %v679_v24, %v680_v30  ;;  %v349_v16 = vrot.slane %v330_v54, 4  ;;  %v682_v17 = vrot.slane %v3066_v5, 4  ;;  %v428_v19 = vrot.slane %v426_v60, 3 }
  0x43   : > { %v3176_v18 = vsel %vm395_vm3, %v507_v35, %v514_v59  ;;  %v431_v23 = vrot.slane %v429_v62, 4  ;;  %v435_v27 = vrot.slane %v433_v63, 3  ;;  %2486 = vmatprep.subr.bf16.mxu0 %v2993_v32  ;;  %v438_v8 = vrot.slane %v436_v10, 4 }
  0x44   : > { %2429 = vmatmul.mubr.msk.bf16.gmra.mxu1 %vm517_vm4, %v3176_v18  ;;  %v365_v5 = vsel %vm356_vm2, 0, %v349_v16  ;;  %v381_v24 = vsel %vm356_vm2, %v349_v16, 0  ;;  %v683_v28 = vrot.slane %v3076_v13, 4  ;;  %v857_v59 = vrot.slane %v421_v20, 5 }
  0x45   : > { %v432_v29 = vor.u32 %v431_v23, %v428_v19  ;;  %2434 = vmatprep.mubr.msk.bf16.mxu1 %vm517_vm4, %v681_v11  ;;  %v441_v30 = vshrl.u32 %v365_v5, 16  ;;  %v444_v35 = vshll.u32 %v365_v5, 16  ;;  %v448_v54 = vshrl.u32 %v381_v24, 16  ;;  %v2251_v11 = vld [vmem:[%s3955_s1 + $0xa] sm:$0x3] }
  0x46   : > { %v439_v15 = vor.u32 %v438_v8, %v435_v27  ;;  %v451_v12 = vshll.u32 %v381_v24, 16  ;;  %v685_v9 = vrot.slane %v3159_v53, 4  ;;  %v686_v0 = vrot.slane %v3162_v21, 4 }
  0x47   : > { %v443_v6 = vrot.slane %v441_v30, 3  ;;  %v446_v16 = vrot.slane %v444_v35, 4  ;;  %v450_v4 = vrot.slane %v448_v54, 3  ;;  %v846_v19 = vrot.slane %v396_v31, 4 }
  0x48   : > { %v3203_v13 = vsel %vm395_vm3, %v432_v29, %v439_v15  ;;  %v453_v20 = vrot.slane %v451_v12, 4  ;;  %v847_v23 = vrot.slane %v399_v46, 5  ;;  %v3212_v8 = vsel %vm356_vm2, %v682_v17, %v683_v28 }
  0x49   : > { %2420 = vmatprep.mubr.msk.bf16.mxu0 %vm517_vm4, %v3203_v13  ;;  %v447_v27 = vor.u32 %v446_v16, %v443_v6  ;;  %v849_v56 = vrot.slane %v403_v47, 4  ;;  %v850_v15 = vrot.slane %v406_v48, 5  ;;  %v3221_v31 = vsel %vm356_vm2, %v685_v9, %v686_v0 }
  0x4a   : > { %v454_v29 = vor.u32 %v453_v20, %v450_v4  ;;  %v848_v7 = vor.u32 %v847_v23, %v846_v19  ;;  %v3224_v46 = vand.u32 %v2251_v11, %v2927_v3  ;;  %v688_v17 = vrot.slane %v365_v5, 4 }
  0x4b   : > { %v851_v6 = vor.u32 %v850_v15, %v849_v56  ;;  %v689_v28 = vrot.slane %v381_v24, 4  ;;  %v855_v45 = vor.u32 %v3108_v25, %v3096_v36  ;;  %v858_v0 = vor.u32 %v857_v59, %v3116_v57  ;;  %v2260_v56 = vld [vmem:[%s3955_s1 + $0xc] sm:$0x3] }
  0x4c   : > { %v3230_v47 = vsel %vm395_vm3, %v447_v27, %v454_v29  ;;  %2435 = vmatmul.mubr.msk.bf16.vlgmr.msra.gmra.mxu1 %vm517_vm4, %v3212_v8  ;;  %v691_v4 = vrot.slane %v2996_v33, 4  ;;  %v860_v48 = vrot.slane %v426_v60, 4  ;;  %v692_v25 = vrot.slane %v2999_v34, 4  ;;  %v284_v29 = vld [vmem:[%s2954_s17 + $0x78] sm:$0xff] }
  0x4d   : > { %2421 = vmatmul.mubr.msk.bf16.gmra.mxu0 %vm517_vm4, %v3230_v47  ;;  %2469 = vmatpush3.bf16.msra.mxu1 %v2983_v26  ;;  %v852_v36 = vsel %vm845_vm5, %v848_v7, %v851_v6  ;;  %v861_v9 = vrot.slane %v429_v62, 5  ;;  %v863_v57 = vrot.slane %v433_v63, 4  ;;  %v864_v26 = vrot.slane %v436_v10, 5 }
  0x4e   : > { %2438 = vmatprep.mubr.msk.bf16.mxu1 %vm517_vm4, %v3221_v31  ;;  %2452 = vmatprep.mubr.msk.bf16.mxu0 %vm517_vm4, %v852_v36  ;;  %v867_v5 = vrot.slane %v441_v30, 4  ;;  %v868_v24 = vrot.slane %v444_v35, 5  ;;  %v3260_v53 = vand.u32 %v2260_v56, %v2927_v3  ;;  %v3263_v62 = vsel %vm356_vm2, %v688_v17, %v689_v28 }
  0x4f   : > { %v862_v60 = vor.u32 %v861_v9, %v860_v48  ;;  %2504 = vmatprep.subr.bf16.mxu1 %v3224_v46  ;;  %v865_v63 = vor.u32 %v864_v26, %v863_v57  ;;  %v870_v59 = vrot.slane %v448_v54, 4  ;;  %v871_v16 = vrot.slane %v451_v12, 5 }
  0x50   : > { %v3266_v11 = vsel %vm845_vm5, %v855_v45, %v858_v0  ;;  %v3269_v21 = vsel %vm356_vm2, %v691_v4, %v692_v25  ;;  %v874_v10 = vrot.slane %v456_v37, 4  ;;  %v875_v30 = vrot.slane %v459_v38, 5 }
  0x51   : > { %v694_v35 = vrot.slane %v3013_v41, 4  ;;  %v695_v20 = vrot.slane %v3016_v42, 4  ;;  %v877_v12 = vrot.slane %v463_v39, 4  ;;  %v878_v54 = vrot.slane %v466_v40, 5  ;;  %v290_v42 = vld [vmem:[%s3071_s15] sm:$0xff] }
  0x52   : > { %v3283_v19 = vsel %vm845_vm5, %v862_v60, %v865_v63  ;;  %v869_v37 = vor.u32 %v868_v24, %v867_v5  ;;  %v697_v33 = vrot.slane %v3020_v43, 4  ;;  %v698_v38 = vrot.slane %v3023_v44, 4 }
  0x53   : > { %v872_v23 = vor.u32 %v871_v16, %v870_v59  ;;  %v876_v27 = vor.u32 %v875_v30, %v874_v10  ;;  %v881_v39 = vrot.slane %v471_v49, 4  ;;  %v882_v34 = vrot.slane %v474_v50, 5  ;;  %v283_v50 = vld [vmem:[%s2954_s17 + $0x70] sm:$0xff]  ;;  %s324_s17 = sor.u32 %s323_s14, %s322_s16  ;;  %s2198_s16 = sshll.u32 %s3689_s9, 6 }
  0x54   : > { %2439 = vmatmul.mubr.msk.bf16.gmra.mxu1 %vm517_vm4, %v3263_v62  ;;  %v700_v40 = vrot.slane %v3119_v58, 4  ;;  %v701_v15 = vrot.slane %v3137_v2, 4  ;;  %v884_v49 = vrot.slane %v478_v51, 4  ;;  %v885_v41 = vrot.slane %v481_v52, 5  ;;  %v291_v52 = vld [vmem:[%s3071_s15 + $0x8] sm:$0xff]  ;;  %s3725_s14 = scalar_lea.vmem [#allocation2], %s2198_s16 }
  0x55   : > { %2453 = vmatmul.mubr.msk.bf16.vlgmr.msra.gmra.mxu0 %vm517_vm4, %v3266_v11  ;;  %2442 = vmatprep.mubr.msk.bf16.mxu1 %vm517_vm4, %v3269_v21  ;;  %v879_v7 = vor.u32 %v878_v54, %v877_v12  ;;  %v888_v6 = vrot.slane %v486_v55, 4  ;;  %v3974_v17 = vshll.u32 %v3020_v43, 16  ;;  %v3975_v51 = vshrl.u32 %v3023_v44, 16  ;;  %s2306_s15 = sshll.u32 %s2798_s22, 5  ;;  %s2024_s12 = sshll.u32 %s3725_s14, 4  ;;  %s3812_s12 = int_to_ptr.vmem [resolvable:$true] %s2024_s12 }
  0x56   : > { %2487 = vmatpush3.bf16.msra.mxu0 %v2993_v32  ;;  %2456 = vmatprep.mubr.msk.bf16.mxu0 %vm517_vm4, %v3283_v19  ;;  %v883_v0 = vor.u32 %v882_v34, %v881_v39  ;;  %v886_v4 = vor.u32 %v885_v41, %v884_v49  ;;  %v3976_v48 = vshll.u32 %v3023_v44, 16  ;;  %v3977_v56 = vshrl.u32 %v3119_v58, 16 }
  0x57   : > { %v889_v28 = vrot.slane %v3974_v17, 5  ;;  %v891_v45 = vrot.slane %v3975_v51, 4  ;;  %2522 = vmatprep.subr.bf16.mxu0 %v3260_v53  ;;  %v3978_v43 = vshll.u32 %v3119_v58, 16  ;;  %v3979_v25 = vshrl.u32 %v3137_v2, 16 }
  0x58   : > { %v892_v32 = vrot.slane %v3976_v48, 5  ;;  %v3322_v36 = vrot.slane %v3977_v56, 4  ;;  %v3980_v57 = vshll.u32 %v3137_v2, 16  ;;  %v335_v26 = vpack.c.bf16 %v284_v29, %v283_v50 }
  0x59   : > { %v3329_v55 = vrot.slane %v3978_v43, 5  ;;  %v3333_v9 = vrot.slane %v3979_v25, 4  ;;  %v3340_v60 = vsel %vm356_vm2, %v694_v35, %v695_v20  ;;  %v3343_v5 = vsel %vm845_vm5, %v869_v37, %v872_v23 }
  0x5a   : > { %v3337_v44 = vrot.slane %v3980_v57, 5  ;;  %v3346_v24 = vsel %vm356_vm2, %v697_v33, %v698_v38  ;;  %v310_v58 = vpack.c.bf16 %v291_v52, %v290_v42  ;;  %v890_v63 = vor.u32 %v889_v28, %v888_v6 }
  0x5b   : > { %v893_v59 = vor.u32 %v892_v32, %v891_v45  ;;  %v354_v16 = vrot.slane %v335_v26, 4  ;;  %v325_v10 = vstv %s324_s17  ;;  %v3349_v30 = vsel %vm845_vm5, %v876_v27, %v879_v7  ;;  %s2332_s17 = sshll.u32 %s2794_s21, 4 }
  0x5c   : > { %v3352_v2 = vsel %vm356_vm2, %v700_v40, %v701_v15  ;;  %v3355_v35 = vsel %vm845_vm5, %v883_v0, %v886_v4  ;;  %v327_v20 = vmul.bf16 %v325_v10, %v310_v58  ;;  %2443 = vmatmul.mubr.msk.bf16.gmra.mxu1 %vm517_vm4, %v3340_v60  ;;  %v897_v12 = vor.u32 %v3329_v55, %v3322_v36  ;;  %s3798_s8 = sadd.s32 %s2332_s17, %s2306_s15  ;;  %s2662_s15 = scalar_lea.vmem %s3812_s12, 1024 }
  0x5d   : > { %v900_v54 = vor.u32 %v3337_v44, %v3333_v9  ;;  %v375_v37 = vsel %vm356_vm2, 0, %v354_v16  ;;  %v386_v33 = vsel %vm356_vm2, %v354_v16, 0  ;;  %2457 = vmatmul.mubr.msk.bf16.gmra.mxu0 %vm517_vm4, %v3343_v5  ;;  %2446 = vmatprep.mubr.msk.bf16.mxu1 %vm517_vm4, %v3346_v24  ;;  %v3372_v34 = vsel %vm845_vm5, %v890_v63, %v893_v59  ;;  %s2307_s30 = sshll.u32 %s3798_s8, 6  ;;  %p2663_p6 = scmp.ne.s32.totalorder %s3812_s12, %s2662_s15 }
  0x5e   : > { %v1044_v38 = vshrl.u32 %v375_v37, 16  ;;  %v1047_v23 = vshll.u32 %v375_v37, 16  ;;  %v1051_v27 = vshrl.u32 %v386_v33, 16  ;;  %v1054_v39 = vshll.u32 %v386_v33, 16  ;;  %2460 = vmatprep.mubr.msk.bf16.mxu0 %vm517_vm4, %v3349_v30  ;;  %s3819_s16 = scalar_lea.hbm %s3957_s3, %s2307_s30  ;;  %s2813_s8 = smov [#allocation2]  }
  0x5f   : > { %v1182_v40 = vrot.slane %v375_v37, 4  ;;  %v1183_v15 = vrot.slane %v386_v33, 4  ;;  %v355_v49 = vrot.slane %v327_v20, 4  ;;  %p2664_p7 = pnand %p2663_p6, %p2901_p3  ;;  %s2666_s30 = sshll.u32 %s2813_s8, 4  ;;  %s2667_s30 = int_to_ptr.vmem [resolvable:$false] %s2666_s30 }
  0x60   : > { %v1046_v41 = vrot.slane %v1044_v38, 3  ;;  %v1049_v50 = vrot.slane %v1047_v23, 4  ;;  %v1053_v29 = vrot.slane %v1051_v27, 3  ;;  %v1056_v7 = vrot.slane %v1054_v39, 4  ;;  %s2668_s10 = scalar_lea.vmem %s2667_s30, 2048  ;;  %p2669_p10 = scmp.lt.s32.totalorder %s3812_s12, %s2667_s30 }
  0x61   : > { %v3375_v6 = vsel %vm356_vm2, %v1182_v40, %v1183_v15  ;;  %v1306_v17 = vrot.slane %v1044_v38, 4  ;;  %v1307_v28 = vrot.slane %v1047_v23, 5  ;;  %v1309_v51 = vrot.slane %v1051_v27, 4  ;;  %p2665_p9 = pneg %p2664_p7  ;;  %p2670_p11 = scmp.lt.s32.totalorder %s2668_s10, %s2662_s15 }
  0x62   : > { %v1050_v45 = vor.u32 %v1049_v50, %v1046_v41  ;;  %v1057_v42 = vor.u32 %v1056_v7, %v1053_v29  ;;  %v1310_v52 = vrot.slane %v1054_v39, 5  ;;  %v377_v0 = vsel %vm356_vm2, 0, %v355_v49 }
  0x63   : > { %v1308_v4 = vor.u32 %v1307_v28, %v1306_v17  ;;  %v387_v48 = vsel %vm356_vm2, %v355_v49, 0  ;;  %v1434_v32 = vshrl.u32 %v377_v0, 16  ;;  %v1437_v56 = vshll.u32 %v377_v0, 16  ;;  %p2671_p12 = por %p2670_p11, %p2669_p10 }
  0x64   : > { %v3380_v36 = vsel %vm395_vm3, %v1050_v45, %v1057_v42  ;;  %v1311_v43 = vor.u32 %v1310_v52, %v1309_v51  ;;  %v1441_v55 = vshrl.u32 %v387_v48, 16  ;;  %v1444_v25 = vshll.u32 %v387_v48, 16  ;;  %2447 = vmatmul.mubr.msk.bf16.gmra.mxu1 %vm517_vm4, %v3352_v2 }
  0x65   : > { %v1436_v9 = vrot.slane %v1434_v32, 3  ;;  %v1439_v57 = vrot.slane %v1437_v56, 4  ;;  %v1572_v44 = vrot.slane %v377_v0, 4  ;;  %v1573_v26 = vrot.slane %v387_v48, 4  ;;  %2461 = vmatmul.mubr.msk.bf16.gmra.mxu0 %vm517_vm4, %v3355_v35  ;;  %2470 = vmatprep.mubr.msk.bf16.mxu1 %vm517_vm4, %v3134_v1  ;;  %v2269_v1 = vld [vmem:[%s3955_s1 + $0xe] sm:$0x3]  ;;  %p2672_p13 = pnand %p2671_p12, %p2665_p9 }
  0x66   : > { %v3389_v58 = vsel %vm845_vm5, %v1308_v4, %v1311_v43  ;;  %v1443_v63 = vrot.slane %v1441_v55, 3  ;;  %v1446_v59 = vrot.slane %v1444_v25, 4  ;;  %v1696_v16 = vrot.slane %v1434_v32, 4  ;;  %2464 = vmatprep.mubr.msk.bf16.mxu0 %vm517_vm4, %v3372_v34 }
  0x67   : > { %v1440_v10 = vor.u32 %v1439_v57, %v1436_v9  ;;  %v3394_v20 = vsel %vm356_vm2, %v1572_v44, %v1573_v26  ;;  %v1697_v37 = vrot.slane %v1437_v56, 5  ;;  %v1699_v33 = vrot.slane %v1441_v55, 4 }
  0x68   : > { %v1447_v38 = vor.u32 %v1446_v59, %v1443_v63  ;;  %v1700_v23 = vrot.slane %v1444_v25, 5  ;;  %v901_v15 = vsel %vm845_vm5, %v897_v12, %v900_v54  ;;  %v1581_v49 = vand.u32 %v2269_v1, %v2927_v3  ;;  %v2278_v12 = vld [vmem:[%s3955_s1 + $0x10] sm:$0x3] }
  0x69   : > { %v1698_v27 = vor.u32 %v1697_v37, %v1696_v16  ;;  %v1709_v54 = vand.u32 %v2278_v12, %v2927_v3 }
  0x6a   : > { %v1448_v39 = vsel %vm395_vm3, %v1440_v10, %v1447_v38  ;;  %v1701_v40 = vor.u32 %v1700_v23, %v1699_v33 }
  0x6c   : > { %v1702_v41 = vsel %vm845_vm5, %v1698_v27, %v1701_v40  ;;  %2471 = vmatmul.mubr.msk.bf16.vlgmr.msra.gmra.mxu1 %vm517_vm4, %v3203_v13 }
  0x6d   : > { %2465 = vmatmul.mubr.msk.bf16.gmra.mxu0 %vm517_vm4, %v901_v15  ;;  %2505 = vmatpush3.bf16.msra.mxu1 %v3224_v46 }
  0x6e   : > { %2474 = vmatprep.mubr.msk.bf16.mxu1 %vm517_vm4, %v3230_v47  ;;  %2488 = vmatprep.mubr.msk.bf16.mxu0 %vm517_vm4, %v3212_v8 }
  0x6f   : > { %2540 = vmatprep.subr.bf16.mxu1 %v1581_v49 }
  0x74   : > { %2475 = vmatmul.mubr.msk.bf16.gmra.mxu1 %vm517_vm4, %v3055_v61 }
  0x75   : > { %2489 = vmatmul.mubr.msk.bf16.vlgmr.msra.gmra.mxu0 %vm517_vm4, %v3221_v31  ;;  %2478 = vmatprep.mubr.msk.bf16.mxu1 %vm517_vm4, %v3079_v14 }
  0x76   : > { %2523 = vmatpush3.bf16.msra.mxu0 %v3260_v53  ;;  %2492 = vmatprep.mubr.msk.bf16.mxu0 %vm517_vm4, %v3263_v62 }
  0x77   : > { %2558 = vmatprep.subr.bf16.mxu0 %v1709_v54 }
  0x7c   : > { %2479 = vmatmul.mubr.msk.bf16.gmra.mxu1 %vm517_vm4, %v3106_v22 }
  0x7d   : > { %2493 = vmatmul.mubr.msk.bf16.gmra.mxu0 %vm517_vm4, %v3269_v21  ;;  %2482 = vmatprep.mubr.msk.bf16.mxu1 %vm517_vm4, %v3176_v18 }
  0x7e   : > { %2496 = vmatprep.mubr.msk.bf16.mxu0 %vm517_vm4, %v3340_v60 }
  0x84   : > { %2483 = vmatmul.mubr.msk.bf16.gmra.mxu1 %vm517_vm4, %v3380_v36 }
  0x85   : > { %2497 = vmatmul.mubr.msk.bf16.gmra.mxu0 %vm517_vm4, %v3346_v24  ;;  %2506 = vmatprep.mubr.msk.bf16.mxu1 %vm517_vm4, %v3266_v11 }
  0x86   : > { %2500 = vmatprep.mubr.msk.bf16.mxu0 %vm517_vm4, %v3352_v2 }
  0x8c   : > { %2507 = vmatmul.mubr.msk.bf16.vlgmr.msra.gmra.mxu1 %vm517_vm4, %v3283_v19 }
  0x8d   : > { %2501 = vmatmul.mubr.msk.bf16.gmra.mxu0 %vm517_vm4, %v3375_v6  ;;  %2541 = vmatpush3.bf16.msra.mxu1 %v1581_v49 }
  0x8e   : > { %2510 = vmatprep.mubr.msk.bf16.mxu1 %vm517_vm4, %v3343_v5  ;;  %2524 = vmatprep.mubr.msk.bf16.mxu0 %vm517_vm4, %v3203_v13 }
  0x94   : > { %2511 = vmatmul.mubr.msk.bf16.gmra.mxu1 %vm517_vm4, %v3349_v30 }
  0x95   : > { %2525 = vmatmul.mubr.msk.bf16.vlgmr.msra.gmra.mxu0 %vm517_vm4, %v3230_v47  ;;  %2514 = vmatprep.mubr.msk.bf16.mxu1 %vm517_vm4, %v3355_v35 }
  0x96   : > { %2559 = vmatpush3.bf16.msra.mxu0 %v1709_v54  ;;  %2528 = vmatprep.mubr.msk.bf16.mxu0 %vm517_vm4, %v3055_v61 }
  0x9c   : > { %2515 = vmatmul.mubr.msk.bf16.gmra.mxu1 %vm517_vm4, %v3372_v34 }
  0x9d   : > { %2529 = vmatmul.mubr.msk.bf16.gmra.mxu0 %vm517_vm4, %v3079_v14  ;;  %2518 = vmatprep.mubr.msk.bf16.mxu1 %vm517_vm4, %v901_v15 }
  0x9e   : > { %2532 = vmatprep.mubr.msk.bf16.mxu0 %vm517_vm4, %v3106_v22 }
  0xa4   : > { %2519 = vmatmul.mubr.msk.bf16.gmra.mxu1 %vm517_vm4, %v3389_v58 }
  0xa5   : > { %2533 = vmatmul.mubr.msk.bf16.gmra.mxu0 %vm517_vm4, %v3176_v18  ;;  %2542 = vmatprep.mubr.msk.bf16.mxu1 %vm517_vm4, %v3221_v31 }
  0xa6   : > { %2536 = vmatprep.mubr.msk.bf16.mxu0 %vm517_vm4, %v3380_v36 }
  0xac   : > { %2543 = vmatmul.mubr.msk.bf16.vlgmr.msra.gmra.mxu1 %vm517_vm4, %v3263_v62  ;;  %v3507_v62 = vld [vmem:[%s3956_s2] ss:$0 sm:$0xff] }
  0xad   : > { %2537 = vmatmul.mubr.msk.bf16.gmra.mxu0 %vm517_vm4, %v1448_v39  ;;  %2546 = vmatprep.mubr.msk.bf16.mxu1 %vm517_vm4, %v3269_v21 }
  0xae   : > { %2560 = vmatprep.mubr.msk.bf16.mxu0 %vm517_vm4, %v3283_v19 }
  0xb4   : > { %2547 = vmatmul.mubr.msk.bf16.gmra.mxu1 %vm517_vm4, %v3340_v60 }
  0xb5   : > { %2561 = vmatmul.mubr.msk.bf16.vlgmr.msra.gmra.mxu0 %vm517_vm4, %v3343_v5  ;;  %2550 = vmatprep.mubr.msk.bf16.mxu1 %vm517_vm4, %v3346_v24 }
  0xb6   : > { %2564 = vmatprep.mubr.msk.bf16.mxu0 %vm517_vm4, %v3349_v30 }
  0xbc   : > { %2551 = vmatmul.mubr.msk.bf16.gmra.mxu1 %vm517_vm4, %v3352_v2 }
  0xbd   : > { %2565 = vmatmul.mubr.msk.bf16.gmra.mxu0 %vm517_vm4, %v3355_v35  ;;  %2554 = vmatprep.mubr.msk.bf16.mxu1 %vm517_vm4, %v3375_v6 }
  0xbe   : > { %2568 = vmatprep.mubr.msk.bf16.mxu0 %vm517_vm4, %v3372_v34 }
  0xc4   : > { %2555 = vmatmul.mubr.msk.bf16.gmra.mxu1 %vm517_vm4, %v3394_v20 }
  0xc5   : > { %2569 = vmatmul.mubr.msk.bf16.gmra.mxu0 %vm517_vm4, %v901_v15 }
  0xc6   : > { %2572 = vmatprep.mubr.msk.bf16.mxu0 %vm517_vm4, %v3389_v58 }
  0xcd   : > { %2573 = vmatmul.mubr.msk.bf16.gmra.mxu0 %vm517_vm4, %v1702_v41 }
  0xf5   : > { %v2426_v3 = vpop.f32.mrf.mxu1 }
  0xf6   : > { %v656_v63 = vadd.f32 %v2426_v3, %v3507_v62 }
  0xf7   : > { %v615_v61 = vpop.f32.mrf.mxu1 }
  0xf8   : > { %v654_v37 = vadd.f32 %v3507_v62, %v615_v61 }
  0xf9   : > { %v2427_v14 = vpop.f32.mrf.mxu1 }
  0xfa   : > { %v657_v27 = vadd.f32 %v2427_v14, %v3507_v62 }
  0xfb   : > { %v618_v22 = vpop.f32.mrf.mxu1 }
  0xfc   : > { %v655_v41 = vadd.f32 %v3507_v62, %v618_v22 }
 0x101   : > { %v2418_v18 = vpop.f32.mrf.mxu0 }
 0x102   : > { %v648_v21 = vadd.f32 %v2418_v18, %v3507_v62 }
 0x103   : > { %v583_v13 = vpop.f32.mrf.mxu0 }
 0x104   : > { %v2430_v8 = vpop.f32.mrf.mxu1  ;;  %v646_v60 = vadd.f32 %v3507_v62, %v583_v13 }
 0x105   : > { %v2419_v31 = vpop.f32.mrf.mxu0  ;;  %v660_v61 = vadd.f32 %v2430_v8, %v3507_v62 }
 0x106   : > { %v3500_v46 = vpop.f32.mrf.mxu1  ;;  %v649_v2 = vadd.f32 %v2419_v31, %v3507_v62 }
 0x107   : > { %v586_v53 = vpop.f32.mrf.mxu0  ;;  %v658_v14 = vadd.f32 %v3507_v62, %v3500_v46 }
 0x108   : > { %v3502_v47 = vpop.f32.mrf.mxu1  ;;  %v647_v29 = vadd.f32 %v3507_v62, %v586_v53 }
 0x10a   : > { %v3509_v11 = vpop.f32.mrf.mxu1 }
 0x10c   : > { %v2436_v19 = vpop.f32.mrf.mxu1 }
 0x10d   : > { %v2422_v5 = vpop.f32.mrf.mxu0  ;;  %v831_v24 = vadd.f32 %v2436_v19, %v648_v21 }
 0x10e   : > { %v766_v30 = vpop.f32.mrf.mxu1  ;;  %v652_v28 = vadd.f32 %v2422_v5, %v3507_v62 }
 0x10f   : > { %v599_v35 = vpop.f32.mrf.mxu0  ;;  %v829_v34 = vadd.f32 %v766_v30, %v646_v60 }
 0x110   : > { %v2437_v50 = vpop.f32.mrf.mxu1  ;;  %v650_v52 = vadd.f32 %v3507_v62, %v599_v35 }
 0x111   : > { %v2423_v7 = vpop.f32.mrf.mxu0  ;;  %v832_v6 = vadd.f32 %v2437_v50, %v649_v2 }
 0x112   : > { %v769_v17 = vpop.f32.mrf.mxu1  ;;  %v653_v56 = vadd.f32 %v2423_v7, %v3507_v62 }
 0x113   : > { %v602_v51 = vpop.f32.mrf.mxu0  ;;  %v830_v45 = vadd.f32 %v769_v17, %v647_v29 }
 0x114   : > { %v2440_v42 = vpop.f32.mrf.mxu1  ;;  %v651_v9 = vadd.f32 %v3507_v62, %v602_v51 }
 0x115   : > { %v835_v0 = vadd.f32 %v2440_v42, %v652_v28  ;;  %v2454_v4 = vpop.f32.mrf.mxu0 }
 0x116   : > { %v3517_v48 = vadd.f32 %v2454_v4, %v831_v24  ;;  %v782_v32 = vpop.f32.mrf.mxu1  ;;  %v661_v24 = vadd.f32 %v3502_v47, %v3507_v62 }
 0x117   : > { %v833_v36 = vadd.f32 %v782_v32, %v650_v52  ;;  %v965_v43 = vpop.f32.mrf.mxu0 }
 0x118   : > { %v3520_v55 = vadd.f32 %v965_v43, %v829_v34  ;;  %v2441_v25 = vpop.f32.mrf.mxu1  ;;  %v659_v34 = vadd.f32 %v3507_v62, %v3509_v11 }
 0x119   : > { %v836_v57 = vadd.f32 %v2441_v25, %v653_v56  ;;  %v2455_v44 = vpop.f32.mrf.mxu0 }
 0x11a   : > { %v3523_v26 = vadd.f32 %v2455_v44, %v832_v6  ;;  %v785_v58 = vpop.f32.mrf.mxu1 }
 0x11b   : > { %v834_v59 = vadd.f32 %v785_v58, %v651_v9  ;;  %v968_v16 = vpop.f32.mrf.mxu0 }
 0x11c   : > { %v3526_v10 = vadd.f32 %v968_v16, %v830_v45  ;;  %v2444_v20 = vpop.f32.mrf.mxu1 }
 0x11d   : > { %v839_v33 = vadd.f32 %v2444_v20, %v656_v63  ;;  %v2458_v38 = vpop.f32.mrf.mxu0 }
 0x11e   : > { %v3529_v23 = vadd.f32 %v2458_v38, %v835_v0  ;;  %v798_v1 = vpop.f32.mrf.mxu1 }
 0x11f   : > { %v837_v39 = vadd.f32 %v798_v1, %v654_v37  ;;  %v981_v40 = vpop.f32.mrf.mxu0 }
 0x120   : > { %v3532_v15 = vadd.f32 %v981_v40, %v833_v36  ;;  %v2445_v49 = vpop.f32.mrf.mxu1 }
 0x121   : > { %v840_v12 = vadd.f32 %v2445_v49, %v657_v27  ;;  %v2459_v54 = vpop.f32.mrf.mxu0 }
 0x122   : > { %v3535_v3 = vadd.f32 %v2459_v54, %v836_v57  ;;  %v801_v18 = vpop.f32.mrf.mxu1 }
 0x123   : > { %v838_v13 = vadd.f32 %v801_v18, %v655_v41  ;;  %v984_v31 = vpop.f32.mrf.mxu0 }
 0x124   : > { %v3538_v53 = vadd.f32 %v984_v31, %v834_v59  ;;  %v2448_v21 = vpop.f32.mrf.mxu1 }
 0x125   : > { %v843_v19 = vadd.f32 %v2448_v21, %v660_v61  ;;  %v2462_v60 = vpop.f32.mrf.mxu0 }
 0x126   : > { %v3542_v5 = vadd.f32 %v2462_v60, %v839_v33  ;;  %v814_v22 = vpop.f32.mrf.mxu1 }
 0x127   : > { %v841_v30 = vadd.f32 %v814_v22, %v658_v14  ;;  %v997_v2 = vpop.f32.mrf.mxu0 }
 0x128   : > { %v3546_v35 = vadd.f32 %v997_v2, %v837_v39  ;;  %v2449_v8 = vpop.f32.mrf.mxu1 }
 0x129   : > { %v844_v50 = vadd.f32 %v2449_v8, %v661_v24  ;;  %v2463_v29 = vpop.f32.mrf.mxu0 }
 0x12a   : > { %v3550_v7 = vadd.f32 %v2463_v29, %v840_v12  ;;  %v817_v46 = vpop.f32.mrf.mxu1 }
 0x12b   : > { %v842_v6 = vadd.f32 %v817_v46, %v659_v34  ;;  %v1000_v17 = vpop.f32.mrf.mxu0 }
 0x12c   : > { %v3552_v28 = vadd.f32 %v1000_v17, %v838_v13  ;;  %v3554_v51 = vpop.f32.mrf.mxu1 }
 0x12d   : > { %v2466_v47 = vpop.f32.mrf.mxu0 }
 0x12e   : > { %v3556_v45 = vadd.f32 %v2466_v47, %v843_v19  ;;  %v3558_v42 = vpop.f32.mrf.mxu1 }
 0x12f   : > { %v1013_v52 = vpop.f32.mrf.mxu0 }
 0x130   : > { %v3560_v0 = vadd.f32 %v1013_v52, %v841_v30  ;;  %v3562_v62 = vpop.f32.mrf.mxu1 }
 0x131   : > { %v2467_v11 = vpop.f32.mrf.mxu0 }
 0x132   : > { %v3564_v4 = vadd.f32 %v2467_v11, %v844_v50  ;;  %v1104_v32 = vpop.f32.mrf.mxu1 }
 0x133   : > { %v1016_v56 = vpop.f32.mrf.mxu0 }
 0x134   : > { %v3566_v36 = vadd.f32 %v1016_v56, %v842_v6  ;;  %v2476_v43 = vpop.f32.mrf.mxu1 }
 0x135   : > { %v2490_v25 = vpop.f32.mrf.mxu0 }
 0x136   : > { %v1117_v9 = vpop.f32.mrf.mxu1 }
 0x137   : > { %v1227_v57 = vpop.f32.mrf.mxu0 }
 0x138   : > { %v2477_v44 = vpop.f32.mrf.mxu1 }
 0x139   : > { %v2491_v58 = vpop.f32.mrf.mxu0 }
 0x13a   : > { %v1120_v63 = vpop.f32.mrf.mxu1 }
 0x13b   : > { %v1230_v59 = vpop.f32.mrf.mxu0 }
 0x13c   : > { %v2480_v16 = vpop.f32.mrf.mxu1 }
 0x13d   : > { %v2494_v20 = vpop.f32.mrf.mxu0 }
 0x13e   : > { %v1133_v37 = vpop.f32.mrf.mxu1 }
 0x13f   : > { %v1243_v33 = vpop.f32.mrf.mxu0 }
 0x140   : > { %v3568_v38 = vpop.f32.mrf.mxu1 }
 0x141   : > { %v3570_v1 = vpop.f32.mrf.mxu0 }
 0x142   : > { %v3572_v27 = vpop.f32.mrf.mxu1 }
 0x143   : > { %v3574_v39 = vpop.f32.mrf.mxu0 }
 0x144   : > { %v3576_v40 = vpop.f32.mrf.mxu1 }
 0x145   : > { %v3578_v49 = vpop.f32.mrf.mxu0 }
 0x146   : > { %v3580_v41 = vpop.f32.mrf.mxu1 }
 0x147   : > { %v3582_v12 = vpop.f32.mrf.mxu0 }
 0x148   : > { %v3584_v54 = vpop.f32.mrf.mxu1 }
 0x149   : > { %v3586_v18 = vpop.f32.mrf.mxu0 }
 0x14a   : > { %v3588_v61 = vpop.f32.mrf.mxu1 }
 0x14b   : > { %v3590_v13 = vpop.f32.mrf.mxu0 }
 0x14c   : > { %v2508_v31 = vpop.f32.mrf.mxu1 }
 0x14d   : > { %v3592_v21 = vpop.f32.mrf.mxu0 }
 0x14e   : > { %v3594_v14 = vpop.f32.mrf.mxu1 }
 0x14f   : > { %v3596_v19 = vpop.f32.mrf.mxu0 }
 0x150   : > { %v3598_v60 = vpop.f32.mrf.mxu1 }
 0x151   : > { %v3600_v22 = vpop.f32.mrf.mxu0 }
 0x152   : > { %v3602_v24 = vpop.f32.mrf.mxu1 }
 0x153   : > { %v3604_v30 = vpop.f32.mrf.mxu0 }
 0x154   : > { %v3606_v2 = vpop.f32.mrf.mxu1 }
 0x155   : > { %3981 = vst [vmem:[#allocation9_spill] sm:$0xff] %v3606_v2  ;;  %v2526_v8 = vpop.f32.mrf.mxu0 }
 0x156   : > { %v3608_v34 = vpop.f32.mrf.mxu1 }
 0x157   : > { %3982 = vst [vmem:[#allocation10_spill] sm:$0xff] %v3608_v34  ;;  %v3610_v50 = vpop.f32.mrf.mxu0 }
 0x158   : > { %3983 = vst [vmem:[#allocation11_spill] sm:$0xff] %v3610_v50  ;;  %v3612_v29 = vpop.f32.mrf.mxu1 }
 0x159   : > { %3984 = vst [vmem:[#allocation12_spill] sm:$0xff] %v3612_v29  ;;  %v3614_v46 = vpop.f32.mrf.mxu0 }
 0x15a   : > { %3985 = vst [vmem:[#allocation13_spill] sm:$0xff] %v3614_v46  ;;  %v3616_v6 = vpop.f32.mrf.mxu1 }
 0x15b   : > { %3986 = vst [vmem:[#allocation14_spill] sm:$0xff] %v3616_v6  ;;  %v3618_v17 = vpop.f32.mrf.mxu0 }
 0x15c   : > { %3987 = vst [vmem:[#allocation15_spill] sm:$0xff] %v3618_v17  ;;  %v3620_v47 = vpop.f32.mrf.mxu1 }
 0x15d   : > { %3988 = vst [vmem:[#allocation16_spill] sm:$0xff] %v3620_v47  ;;  %v3622_v52 = vpop.f32.mrf.mxu0 }
 0x15e   : > { %3989 = vst [vmem:[#allocation17_spill] sm:$0xff] %v3622_v52  ;;  %v3624_v11 = vpop.f32.mrf.mxu1 }
 0x15f   : > { %3990 = vst [vmem:[#allocation18_spill] sm:$0xff] %v3624_v11  ;;  %v3626_v56 = vpop.f32.mrf.mxu0 }
 0x160   : > { %3991 = vst [vmem:[#allocation19_spill] sm:$0xff] %v3626_v56  ;;  %v3628_v2 = vpop.f32.mrf.mxu1 }
 0x161   : > { %3992 = vst [vmem:[#allocation20_spill] sm:$0xff] %v3628_v2  ;;  %v3630_v34 = vpop.f32.mrf.mxu0  ;;  %v1166_v2 = vadd.f32 %v3554_v51, %v3517_v48  ;;  %v1171_v48 = vadd.f32 %v2477_v44, %v3535_v3  ;;  %v1173_v3 = vadd.f32 %v3572_v27, %v3552_v28  ;;  %v1179_v28 = vadd.f32 %v3584_v54, %v3564_v4 }
 0x162   : > { %3993 = vst [vmem:[#allocation21_spill] sm:$0xff] %v3630_v34  ;;  %v3632_v50 = vpop.f32.mrf.mxu1 }
 0x163   : > { %3994 = vst [vmem:[#allocation22_spill] sm:$0xff] %v3632_v50  ;;  %v3634_v29 = vpop.f32.mrf.mxu0  ;;  %v1164_v50 = vadd.f32 %v3558_v42, %v3520_v55  ;;  %v1169_v55 = vadd.f32 %v1120_v63, %v3538_v53  ;;  %v1177_v63 = vadd.f32 %v3588_v61, %v3566_v36 }
 0x164   : > { %3995 = vst [vmem:[#allocation23_spill] sm:$0xff] %v3634_v29  ;;  %v3636_v46 = vpop.f32.mrf.mxu1 }
 0x165   : > { %3996 = vst [vmem:[#allocation24_spill] sm:$0xff] %v3636_v46  ;;  %v3638_v6 = vpop.f32.mrf.mxu0  ;;  %v1167_v46 = vadd.f32 %v3562_v62, %v3523_v26  ;;  %v1290_v29 = vadd.f32 %v1227_v57, %v1164_v50  ;;  %v1174_v26 = vadd.f32 %v2480_v16, %v3542_v5  ;;  %v1172_v62 = vadd.f32 %v1133_v37, %v3546_v35 }
 0x166   : > { %3997 = vst [vmem:[#allocation25_spill] sm:$0xff] %v3638_v6  ;;  %v3640_v17 = vpop.f32.mrf.mxu1  ;;  %v1165_v6 = vadd.f32 %v1104_v32, %v3526_v10  ;;  %v1295_v53 = vadd.f32 %v3574_v39, %v1169_v55  ;;  %v1178_v5 = vadd.f32 %v3576_v40, %v3556_v45  ;;  %v1299_v45 = vadd.f32 %v3590_v13, %v1173_v3  ;;  %v4003_v39 = vld [vmem:[#allocation9_spill] sm:$0xff]  ;;  %v4006_v13 = vld [vmem:[#allocation12_spill] sm:$0xff] }
 0x167   : > { %3998 = vst [vmem:[#allocation26_spill] sm:$0xff] %v3640_v17  ;;  %v3642_v47 = vpop.f32.mrf.mxu0  ;;  %v1293_v51 = vadd.f32 %v2491_v58, %v1167_v46  ;;  %v1300_v35 = vadd.f32 %v3578_v49, %v1174_v26  ;;  %v1298_v44 = vadd.f32 %v3582_v12, %v1172_v62  ;;  %v1418_v16 = vadd.f32 %v3594_v14, %v1290_v29  ;;  %v4004_v49 = vld [vmem:[#allocation11_spill] sm:$0xff] }
 0x168   : > { %3999 = vst [vmem:[#allocation27_spill] sm:$0xff] %v3642_v47  ;;  %v3644_v52 = vpop.f32.mrf.mxu1  ;;  %v1170_v47 = vadd.f32 %v2476_v43, %v3529_v23  ;;  %v1291_v42 = vadd.f32 %v1230_v59, %v1165_v6  ;;  %v1297_v43 = vadd.f32 %v3570_v1, %v1171_v48  ;;  %v1303_v27 = vadd.f32 %v3604_v30, %v1177_v63  ;;  %v4010_v30 = vld [vmem:[#allocation16_spill] sm:$0xff]  ;;  %v4011_v6 = vld [vmem:[#allocation17_spill] sm:$0xff] }
 0x169   : > { %4000 = vst [vmem:[#allocation28_spill] sm:$0xff] %v3644_v52  ;;  %v3646_v11 = vpop.f32.mrf.mxu0  ;;  %v1292_v52 = vadd.f32 %v2490_v25, %v1166_v2  ;;  %v4015_v26 = vld [vmem:[#allocation21_spill] sm:$0xff] }
 0x16a   : > { %4001 = vst [vmem:[#allocation29_spill] sm:$0xff] %v3646_v11  ;;  %v3652_v34 = vpop.f32.mrf.mxu1  ;;  %v1168_v11 = vadd.f32 %v1117_v9, %v3532_v15  ;;  %v1296_v10 = vadd.f32 %v2494_v20, %v1170_v47  ;;  %v1175_v15 = vadd.f32 %v3568_v38, %v3550_v7  ;;  %v1176_v9 = vadd.f32 %v3580_v41, %v3560_v0  ;;  %v4016_v62 = vld [vmem:[#allocation22_spill] sm:$0xff] }
 0x16b   : > { %4002 = vst [vmem:[#allocation30_spill] sm:$0xff] %v3652_v34  ;;  %v3657_v17 = vpop.f32.mrf.mxu0  ;;  %v1420_v7 = vadd.f32 %v2508_v31, %v1292_v52  ;;  %v1304_v0 = vadd.f32 %v3592_v21, %v1178_v5  ;;  %v1421_v38 = vadd.f32 %v3598_v60, %v1293_v51  ;;  %v1419_v36 = vadd.f32 %v3602_v24, %v1291_v42  ;;  %v4007_v21 = vld [vmem:[#allocation13_spill] sm:$0xff]  ;;  %v4009_v24 = vld [vmem:[#allocation15_spill] sm:$0xff]  ;;  %v4012_v52 = vld [vmem:[#allocation18_spill] sm:$0xff] }
 0x16c   : > { %v2544_v56 = vpop.f32.mrf.mxu1  ;;  %v1294_v32 = vadd.f32 %v1243_v33, %v1168_v11  ;;  %v1301_v58 = vadd.f32 %v3586_v18, %v1175_v15  ;;  %v1302_v4 = vadd.f32 %v3596_v19, %v1176_v9  ;;  %v1305_v33 = vadd.f32 %v3600_v22, %v1179_v28  ;;  %v4005_v18 = vld [vmem:[#allocation10_spill] sm:$0xff]  ;;  %v4014_v51 = vld [vmem:[#allocation20_spill] sm:$0xff] }
 0x16d   : > { %v3663_v34 = vpop.f32.mrf.mxu0  ;;  %v1556_v20 = vadd.f32 %v2526_v8, %v1420_v7  ;;  %v1424_v40 = vadd.f32 %v4003_v39, %v1296_v10  ;;  %v1554_v41 = vadd.f32 %v4004_v49, %v1418_v16  ;;  %v1425_v31 = vadd.f32 %v4006_v13, %v1297_v43  ;;  %v4008_v19 = vld [vmem:[#allocation14_spill] sm:$0xff]  ;;  %v4018_v5 = vld [vmem:[#allocation24_spill] sm:$0xff]  ;;  %v4019_v9 = vld [vmem:[#allocation25_spill] sm:$0xff] }
 0x16e   : > { %v1617_v23 = vpop.f32.mrf.mxu1  ;;  %v1422_v61 = vadd.f32 %v4005_v18, %v1294_v32  ;;  %v1557_v14 = vadd.f32 %v4007_v21, %v1421_v38  ;;  %v1423_v60 = vadd.f32 %v4008_v19, %v1295_v53  ;;  %v1555_v2 = vadd.f32 %v4009_v24, %v1419_v36  ;;  %v4020_v63 = vld [vmem:[#allocation26_spill] sm:$0xff] }
 0x16f   : > { %v3673_v25 = vpop.f32.mrf.mxu0  ;;  %v1682_v12 = vadd.f32 %v2544_v56, %v1556_v20  ;;  %v1428_v8 = vadd.f32 %v4010_v30, %v1300_v35  ;;  %v1680_v50 = vadd.f32 %v1617_v23, %v1554_v41  ;;  %v1560_v47 = vadd.f32 %v4011_v6, %v1424_v40  ;;  %v4013_v56 = vld [vmem:[#allocation19_spill] sm:$0xff] }
 0x170   : > { %v2545_v57 = vpop.f32.mrf.mxu1  ;;  %v1426_v11 = vadd.f32 %v4012_v52, %v1298_v44  ;;  %v1558_v48 = vadd.f32 %v4013_v56, %v1422_v61  ;;  %v1429_v55 = vadd.f32 %v4014_v51, %v1301_v58  ;;  %v1561_v10 = vadd.f32 %v4015_v26, %v1425_v31  ;;  %v4017_v23 = vld [vmem:[#allocation23_spill] sm:$0xff] }
 0x171   : > { %v3686_v59 = vpop.f32.mrf.mxu0  ;;  %v1427_v32 = vadd.f32 %v4016_v62, %v1299_v45  ;;  %v1559_v53 = vadd.f32 %v4017_v23, %v1423_v60  ;;  %v1432_v35 = vadd.f32 %v4018_v5, %v1304_v0  ;;  %v1564_v7 = vadd.f32 %v4019_v9, %v1428_v8  ;;  %v4021_v58 = vld [vmem:[#allocation27_spill] sm:$0xff]  ;;  %v4022_v45 = vld [vmem:[#allocation28_spill] sm:$0xff]  ;;  %v4023_v40 = vld [vmem:[#allocation29_spill] sm:$0xff] }
 0x172   : > { %v1620_v37 = vpop.f32.mrf.mxu1  ;;  %v1683_v44 = vadd.f32 %v2545_v57, %v1557_v14  ;;  %v1430_v16 = vadd.f32 %v4020_v63, %v1302_v4  ;;  %v3721_v20 = vadd.f32 %v4021_v58, %v1426_v11  ;;  %v1433_v0 = vadd.f32 %v4022_v45, %v1305_v33  ;;  %v4024_v49 = vld [vmem:[#allocation30_spill] sm:$0xff] }
 0x173   : > { %v3698_v1 = vpop.f32.mrf.mxu0  ;;  %v1681_v38 = vadd.f32 %v1620_v37, %v1555_v2  ;;  %v3731_v57 = vadd.f32 %v4023_v40, %v1429_v55  ;;  %v3734_v4 = vadd.f32 %v4024_v49, %v1303_v27  ;;  %v3737_v37 = vadd.f32 %v3657_v17, %v1427_v32 }
 0x174   : > { %v2548_v54 = vpop.f32.mrf.mxu1  ;;  %v3742_v33 = vadd.f32 %v3663_v34, %v1432_v35  ;;  %v3754_v51 = vadd.f32 %v3673_v25, %v1430_v16 }
 0x175   : > { %v2562_v22 = vpop.f32.mrf.mxu0  ;;  %v1686_v18 = vadd.f32 %v2548_v54, %v1560_v47 }
 0x176   : > { %v1810_v29 = vadd.f32 %v2562_v22, %v1682_v12  ;;  %v1633_v46 = vpop.f32.mrf.mxu1 }
 0x177   : > { %v1745_v42 = vpop.f32.mrf.mxu0  ;;  %v1684_v30 = vadd.f32 %v1633_v46, %v1558_v48 }
 0x178   : > { %v2318_v15 = vpack.c.bf16 %v1810_v29, %v1810_v29  ;;  %v1808_v43 = vadd.f32 %v1745_v42, %v1680_v50  ;;  %v2549_v3 = vpop.f32.mrf.mxu1  ;;  %v1947_v21 = vmul.f32 %v1810_v29, %v1810_v29  ;;  %v1909_v2 = vsel %vm1905_vm7, %v1810_v29, 0.0 }
 0x179   : > { %v2563_v28 = vpop.f32.mrf.mxu0  ;;  %v1687_v8 = vadd.f32 %v2549_v3, %v1561_v10 }
 0x17a   : > { %v2316_v36 = vpack.c.bf16 %v1808_v43, %v1808_v43  ;;  %v1636_v39 = vpop.f32.mrf.mxu1  ;;  %1891 = vst.msk [vmem:[%s3725_s14 + $0x8] sm:$0xf] %vm1888_vm6, %v2318_v15  ;;  %v1811_v41 = vadd.f32 %v2563_v28, %v1683_v44  ;;  %v1945_v61 = vmul.f32 %v1808_v43, %v1808_v43  ;;  %v1906_v14 = vsel %vm1905_vm7, %v1808_v43, 0.0 }
 0x17b   : > { %v1748_v12 = vpop.f32.mrf.mxu0  ;;  %v1964_v42 = vsel %vm1905_vm7, %v1947_v21, 0.0  ;;  %v1685_v10 = vadd.f32 %v1636_v39, %v1559_v53  ;;  %v1569_v53 = vadd.f32 %v3686_v59, %v1433_v0 }
 0x17c   : > { %v1809_v13 = vadd.f32 %v1748_v12, %v1681_v38  ;;  %v2552_v31 = vpop.f32.mrf.mxu1  ;;  %1889 = vst.msk [vmem:[%s3725_s14] sm:$0xf] %vm1888_vm6, %v2316_v36  ;;  %v2319_v27 = vpack.c.bf16 %v1811_v41, %v1811_v41  ;;  %v1961_v34 = vsel %vm1905_vm7, %v1945_v61, 0.0  ;;  %v1948_v47 = vmul.f32 %v1811_v41, %v1811_v41 }
 0x17d   : > { %v2566_v19 = vpop.f32.mrf.mxu0  ;;  %v1911_v26 = vsel %vm1905_vm7, %v1811_v41, 0.0  ;;  %v1690_v43 = vadd.f32 %v2552_v31, %v1564_v7  ;;  %v1567_v12 = vadd.f32 %v3698_v1, %v3734_v4 }
 0x17e   : > { %v2317_v60 = vpack.c.bf16 %v1809_v13, %v1809_v13  ;;  %v1907_v17 = vsel %vm1905_vm7, %v1809_v13, 0.0  ;;  %v1946_v22 = vmul.f32 %v1809_v13, %v1809_v13  ;;  %v1814_v54 = vadd.f32 %v2566_v19, %v1686_v18  ;;  %v1649_v24 = vpop.f32.mrf.mxu1  ;;  %1892 = vst.msk [vmem:[%s3725_s14 + $0xc] sm:$0xf] %vm1888_vm6, %v2319_v27 }
 0x17f   : > { %v1908_v50 = vadd.f32 %v1907_v17, %v1906_v14  ;;  %v1761_v6 = vpop.f32.mrf.mxu0  ;;  %v1966_v5 = vsel %vm1905_vm7, %v1948_v47, 0.0  ;;  %v1688_v36 = vadd.f32 %v1649_v24, %v3721_v20 }
 0x180   : > { %v1962_v52 = vsel %vm1905_vm7, %v1946_v22, 0.0  ;;  %v2322_v11 = vpack.c.bf16 %v1814_v54, %v1814_v54  ;;  %v2553_v56 = vpop.f32.mrf.mxu1  ;;  %1890 = vst.msk [vmem:[%s3725_s14 + $0x4] sm:$0xf] %vm1888_vm6, %v2317_v60  ;;  %v1812_v48 = vadd.f32 %v1761_v6, %v1684_v30  ;;  %v1951_v7 = vmul.f32 %v1814_v54, %v1814_v54 }
 0x181   : > { %v1910_v29 = vadd.f32 %v1909_v2, %v1908_v50  ;;  %v1963_v46 = vadd.f32 %v1962_v52, %v1961_v34  ;;  %v2567_v55 = vpop.f32.mrf.mxu0  ;;  %v1691_v18 = vadd.f32 %v2553_v56, %v3731_v57  ;;  %v1917_v31 = vsel %vm1905_vm7, %v1814_v54, 0.0 }
 0x182   : > { %v1815_v62 = vadd.f32 %v2567_v55, %v1687_v8  ;;  %v1652_v32 = vpop.f32.mrf.mxu1  ;;  %1895 = vst.msk [vmem:[%s3725_s14 + $0x18] sm:$0xf] %vm1888_vm6, %v2322_v11  ;;  %v2320_v3 = vpack.c.bf16 %v1812_v48, %v1812_v48  ;;  %v1913_v35 = vsel %vm1905_vm7, %v1812_v48, 0.0  ;;  %v1949_v9 = vmul.f32 %v1812_v48, %v1812_v48 }
 0x183   : > { %v1965_v15 = vadd.f32 %v1964_v42, %v1963_v46  ;;  %v1912_v23 = vadd.f32 %v1911_v26, %v1910_v29  ;;  %v1764_v25 = vpop.f32.mrf.mxu0  ;;  %v1972_v60 = vsel %vm1905_vm7, %v1951_v7, 0.0  ;;  %v1689_v57 = vadd.f32 %v1652_v32, %v3737_v37 }
 0x184   : > { %v2323_v44 = vpack.c.bf16 %v1815_v62, %v1815_v62  ;;  %v2556_v28 = vpop.f32.mrf.mxu1  ;;  %v1813_v58 = vadd.f32 %v1764_v25, %v1685_v10  ;;  %1893 = vst.msk [vmem:[%s3725_s14 + $0x10] sm:$0xf] %vm1888_vm6, %v2320_v3  ;;  %v1968_v39 = vsel %vm1905_vm7, %v1949_v9, 0.0  ;;  %v1952_v21 = vmul.f32 %v1815_v62, %v1815_v62 }
 0x185   : > { %v1914_v63 = vadd.f32 %v1913_v35, %v1912_v23  ;;  %v1967_v16 = vadd.f32 %v1966_v5, %v1965_v15  ;;  %v2570_v38 = vpop.f32.mrf.mxu0  ;;  %v1919_v1 = vsel %vm1905_vm7, %v1815_v62, 0.0  ;;  %v1694_v8 = vadd.f32 %v2556_v28, %v3742_v33 }
 0x186   : > { %v1818_v45 = vadd.f32 %v2570_v38, %v1690_v43  ;;  %1896 = vst.msk [vmem:[%s3725_s14 + $0x1c] sm:$0xf] %vm1888_vm6, %v2323_v44  ;;  %v2321_v49 = vpack.c.bf16 %v1813_v58, %v1813_v58  ;;  %v1915_v41 = vsel %vm1905_vm7, %v1813_v58, 0.0  ;;  %v1950_v59 = vmul.f32 %v1813_v58, %v1813_v58  ;;  %v1665_v13 = vpop.f32.mrf.mxu1 }
 0x187   : > { %v1969_v40 = vadd.f32 %v1968_v39, %v1967_v16  ;;  %v1777_v0 = vpop.f32.mrf.mxu0  ;;  %v1916_v61 = vadd.f32 %v1915_v41, %v1914_v63  ;;  %v1974_v47 = vsel %vm1905_vm7, %v1952_v21, 0.0  ;;  %v1692_v37 = vadd.f32 %v1665_v13, %v3754_v51 }
 0x188   : > { %v2326_v20 = vpack.c.bf16 %v1818_v45, %v1818_v45  ;;  %v1970_v14 = vsel %vm1905_vm7, %v1950_v59, 0.0  ;;  %v1816_v27 = vadd.f32 %v1777_v0, %v1688_v36  ;;  %1894 = vst.msk [vmem:[%s3725_s14 + $0x14] sm:$0xf] %vm1888_vm6, %v2321_v49  ;;  %v2557_v6 = vpop.f32.mrf.mxu1  ;;  %v1955_v52 = vmul.f32 %v1818_v45, %v1818_v45 }
 0x189   : > { %v2571_v19 = vpop.f32.mrf.mxu0  ;;  %v1918_v17 = vadd.f32 %v1917_v31, %v1916_v61  ;;  %v1971_v22 = vadd.f32 %v1970_v14, %v1969_v40  ;;  %v1695_v15 = vadd.f32 %v2557_v6, %v1569_v53  ;;  %v1925_v23 = vsel %vm1905_vm7, %v1818_v45, 0.0 }
 0x18a   : > { %v1819_v24 = vadd.f32 %v2571_v19, %v1691_v18  ;;  %1899 = vst.msk [vmem:[%s3725_s14 + $0x28] sm:$0xf] %vm1888_vm6, %v2326_v20  ;;  %v2324_v4 = vpack.c.bf16 %v1816_v27, %v1816_v27  ;;  %v1953_v54 = vmul.f32 %v1816_v27, %v1816_v27  ;;  %v1921_v11 = vsel %vm1905_vm7, %v1816_v27, 0.0  ;;  %v1668_v43 = vpop.f32.mrf.mxu1 }
 0x18b   : > { %v1780_v2 = vpop.f32.mrf.mxu0  ;;  %v1973_v30 = vadd.f32 %v1972_v60, %v1971_v22  ;;  %v1920_v50 = vadd.f32 %v1919_v1, %v1918_v17  ;;  %v1980_v44 = vsel %vm1905_vm7, %v1955_v52, 0.0  ;;  %v1693_v58 = vadd.f32 %v1668_v43, %v1567_v12 }
 0x18c   : > { %v2327_v34 = vpack.c.bf16 %v1819_v24, %v1819_v24  ;;  %v1817_v56 = vadd.f32 %v1780_v2, %v1689_v57  ;;  %1897 = vst.msk [vmem:[%s3725_s14 + $0x20] sm:$0xf] %vm1888_vm6, %v2324_v4  ;;  %v1976_v33 = vsel %vm1905_vm7, %v1953_v54, 0.0  ;;  %v1956_v25 = vmul.f32 %v1819_v24, %v1819_v24 }
 0x18d   : > { %v2574_v29 = vpop.f32.mrf.mxu0  ;;  %v1922_v46 = vadd.f32 %v1921_v11, %v1920_v50  ;;  %v1975_v48 = vadd.f32 %v1974_v47, %v1973_v30  ;;  %v1927_v16 = vsel %vm1905_vm7, %v1819_v24, 0.0 }
 0x18e   : > { %v1822_v55 = vadd.f32 %v2574_v29, %v1694_v8  ;;  %1900 = vst.msk [vmem:[%s3725_s14 + $0x2c] sm:$0xf] %vm1888_vm6, %v2327_v34  ;;  %v2325_v42 = vpack.c.bf16 %v1817_v56, %v1817_v56  ;;  %v1923_v26 = vsel %vm1905_vm7, %v1817_v56, 0.0  ;;  %v1954_v10 = vmul.f32 %v1817_v56, %v1817_v56 }
 0x18f   : > { %v1793_v62 = vpop.f32.mrf.mxu0  ;;  %v1977_v32 = vadd.f32 %v1976_v33, %v1975_v48  ;;  %v1924_v51 = vadd.f32 %v1923_v26, %v1922_v46  ;;  %v1982_v49 = vsel %vm1905_vm7, %v1956_v25, 0.0 }
 0x190   : > { %v2330_v3 = vpack.c.bf16 %v1822_v55, %v1822_v55  ;;  %v1978_v5 = vsel %vm1905_vm7, %v1954_v10, 0.0  ;;  %v1820_v35 = vadd.f32 %v1793_v62, %v1692_v37  ;;  %1898 = vst.msk [vmem:[%s3725_s14 + $0x24] sm:$0xf] %vm1888_vm6, %v2325_v42  ;;  %v1959_v0 = vmul.f32 %v1822_v55, %v1822_v55 }
 0x191   : > { %v2575_v9 = vpop.f32.mrf.mxu0  ;;  %v1926_v28 = vadd.f32 %v1925_v23, %v1924_v51  ;;  %v1979_v53 = vadd.f32 %v1978_v5, %v1977_v32  ;;  %v1933_v27 = vsel %vm1905_vm7, %v1822_v55, 0.0 }
 0x192   : > { %v1823_v63 = vadd.f32 %v2575_v9, %v1695_v15  ;;  %1903 = vst.msk [vmem:[%s3725_s14 + $0x38] sm:$0xf] %vm1888_vm6, %v2330_v3  ;;  %v2328_v38 = vpack.c.bf16 %v1820_v35, %v1820_v35  ;;  %v1957_v7 = vmul.f32 %v1820_v35, %v1820_v35  ;;  %v1929_v41 = vsel %vm1905_vm7, %v1820_v35, 0.0 }
 0x193   : > { %v1796_v36 = vpop.f32.mrf.mxu0  ;;  %v1981_v39 = vadd.f32 %v1980_v44, %v1979_v53  ;;  %v1928_v45 = vadd.f32 %v1927_v16, %v1926_v28 }
 0x194   : > { %v2331_v40 = vpack.c.bf16 %v1823_v63, %v1823_v63  ;;  %v1821_v59 = vadd.f32 %v1796_v36, %v1693_v58  ;;  %1901 = vst.msk [vmem:[%s3725_s14 + $0x30] sm:$0xf] %vm1888_vm6, %v2328_v38  ;;  %v1984_v61 = vsel %vm1905_vm7, %v1957_v7, 0.0  ;;  %v1960_v19 = vmul.f32 %v1823_v63, %v1823_v63 }
 0x195   : > { %v1930_v18 = vadd.f32 %v1929_v41, %v1928_v45  ;;  %v1983_v12 = vadd.f32 %v1982_v49, %v1981_v39 }
 0x196   : > { %1904 = vst.msk [vmem:[%s3725_s14 + $0x3c] sm:$0xf] %vm1888_vm6, %v2331_v40  ;;  %v2329_v20 = vpack.c.bf16 %v1821_v59, %v1821_v59  ;;  %v1931_v13 = vsel %vm1905_vm7, %v1821_v59, 0.0  ;;  %v1958_v31 = vmul.f32 %v1821_v59, %v1821_v59 }
 0x197   : > { %v1985_v21 = vadd.f32 %v1984_v61, %v1983_v12  ;;  %v1932_v14 = vadd.f32 %v1931_v13, %v1930_v18 }
 0x198   : > { %v1986_v60 = vsel %vm1905_vm7, %v1958_v31, 0.0  ;;  %1902 = vst.msk [vmem:[%s3725_s14 + $0x34] sm:$0xf] %vm1888_vm6, %v2329_v20 }
 0x199   : > { %v1934_v17 = vadd.f32 %v1933_v27, %v1932_v14  ;;  %v1987_v22 = vadd.f32 %v1986_v60, %v1985_v21 }
 0x19a   : > { %2675 = shalt.err (!%p2672_p13)
}
 0x19b   : > { %s2676_s14 = scalar_lea.hbm %s3819_s16, 1024  ;;  %s2680_s8 = scalar_lea.hbm %s3957_s3, 4096 }
 0x19c   : > { %p2677_p0 = scmp.ne.s32.totalorder %s3819_s16, %s2676_s14  ;;  %p2681_p4 = scmp.lt.s32.totalorder %s3819_s16, %s3957_s3 }
 0x19d   : > { %p2682_p5 = scmp.lt.s32.totalorder %s2680_s8, %s2676_s14 }
 0x19e   : > { %p2678_p1 = pnand %p2677_p0, %p2901_p3 }
 0x19f   : > { %p2683_p6 = por %p2682_p5, %p2681_p4 }
 0x1a0   : > { %p2679_p2 = pneg %p2678_p1 }
 0x1a2   : > { %p2684_p7 = pnand %p2683_p6, %p2679_p2 }
 0x1a4   : > { %2687 = shalt.err (!%p2684_p7)
}
 0x1a5   : > { %s2814_s15 = smov 64   ;;  %s2815_s30 = smov 4   ;;  %v1988_v24 = vsel %vm1905_vm7, %v1959_v0, 0.0  ;;  %v1935_v1 = vsel %vm1905_vm7, %v1823_v63, 0.0  ;;  %v1990_v54 = vsel %vm1905_vm7, %v1960_v19, 0.0  ;;  %vm1943_vm8 = vcmask 253952  }
 0x1a6   : > { %s4025_s10 = scalar_lea.sflag [#allocation3], %s3689_s9  ;;  %v1936_v57 = vadd.f32 %v1935_v1, %v1934_v17  ;;  %v1989_v4 = vadd.f32 %v1988_v24, %v1987_v22  ;;  %s2308_s26 = sshll.u32 %s2798_s22, 1 }
 0x1a7   : > { %2578 = dma.vmem_to_hbm [thread:$0]  (%p2901_p3), %s3812_s12, 1024, %s3819_s16, %s4025_s10, %s2814_s15, %s2814_s15, %s2815_s30  }
 0x1a8   : > { %v1937_v2 = vrot.slane %v1936_v57, 4  ;;  %v1991_v30 = vadd.f32 %v1990_v54, %v1989_v4  ;;  %s2038_s27 = sadd.s32 %s2794_s21, %s2308_s26  ;;  %s4026_s12 = sadd.s32 4294967295, %s2810_s25  }
 0x1a9   : > { %s3855_s16 = sand.u32 1, %s4026_s12   ;;  %s2309_s17 = sshll.u32 %s2038_s27, 4 }
 0x1aa   : > { %v1992_v8 = vrot.slane %v1991_v30, 4  ;;  %v1938_v50 = vadd.f32 %v1937_v2, %v1936_v57  ;;  %s245_s14 = scalar_lea.vmem [#allocation4], %s3689_s9  ;;  %s3969_s22 = scalar_lea.vmem [#allocation6], %s3689_s9 }
 0x1ab   : > { %s2042_s13 = sshll.u32 %s245_s14, 4  ;;  %s2057_s8 = sshll.u32 %s3969_s22, 4  ;;  %s3866_s13 = int_to_ptr.vmem [resolvable:$true] %s2042_s13  ;;  %s3874_s8 = int_to_ptr.vmem [resolvable:$true] %s2057_s8 }
 0x1ac   : > { %v1993_v6 = vadd.f32 %v1992_v8, %v1991_v30  ;;  %v1939_v34 = vrot.slane %v1938_v50, 2  ;;  %s3864_s21 = scalar_lea.hbm %s3958_s4, %s2309_s17  ;;  %s3872_s27 = scalar_lea.hbm %s3959_s5, %s2309_s17 }
 0x1ad   : > { %s2688_s15 = scalar_lea.vmem %s3866_s13, 16  ;;  %s2816_s30 = smov [#allocation4]  }
 0x1ae   : > { %v1940_v47 = vadd.f32 %v1939_v34, %v1938_v50  ;;  %v1994_v52 = vrot.slane %v1993_v6, 2  ;;  %p2689_p9 = scmp.ne.s32.totalorder %s3866_s13, %s2688_s15  ;;  %s2692_s22 = sshll.u32 %s2816_s30, 4  ;;  %s2693_s22 = int_to_ptr.vmem [resolvable:$false] %s2692_s22 }
 0x1af   : > { %s2694_s0 = scalar_lea.vmem %s2693_s22, 32  ;;  %p2695_p12 = scmp.lt.s32.totalorder %s3866_s13, %s2693_s22 }
 0x1b0   : > { %v1941_v11 = vrot.slane %v1940_v47, 1  ;;  %v1995_v56 = vadd.f32 %v1994_v52, %v1993_v6  ;;  %p2690_p10 = pnand %p2689_p9, %p2901_p3  ;;  %p2696_p13 = scmp.lt.s32.totalorder %s2694_s0, %s2688_s15 }
 0x1b2   : > { %v1942_v29 = vadd.f32 %v1941_v11, %v1940_v47  ;;  %v1996_v37 = vrot.slane %v1995_v56, 1  ;;  %p2691_p11 = pneg %p2690_p10  ;;  %p2697_p0 = por %p2696_p13, %p2695_p12 }
 0x1b4   : > { %1944 = vst.msk [vmem:[%s245_s14] sm:$0x1] %vm1943_vm8, %v1942_v29  ;;  %v1997_v46 = vadd.f32 %v1996_v37, %v1995_v56  ;;  %p2698_p1 = pnand %p2697_p0, %p2691_p11 }
 0x1b6   : > { %2701 = shalt.err (!%p2698_p1)
}
 0x1b7   : > { %s2702_s17 = scalar_lea.hbm %s3864_s21, 16  ;;  %s2706_s26 = scalar_lea.hbm %s3958_s4, 64 }
 0x1b8   : > { %p2703_p2 = scmp.ne.s32.totalorder %s3864_s21, %s2702_s17  ;;  %p2707_p6 = scmp.lt.s32.totalorder %s3864_s21, %s3958_s4 }
 0x1b9   : > { %p2708_p7 = scmp.lt.s32.totalorder %s2706_s26, %s2702_s17 }
 0x1ba   : > { %p2704_p4 = pnand %p2703_p2, %p2901_p3 }
 0x1bb   : > { %p2709_p9 = por %p2708_p7, %p2707_p6 }
 0x1bc   : > { %p2705_p5 = pneg %p2704_p4 }
 0x1be   : > { %p2710_p10 = pnand %p2709_p9, %p2705_p5 }
 0x1c0   : > { %2713 = shalt.err (!%p2710_p10)
}
 0x1c1   : > { %s4027_s0 = scalar_lea.sflag [#allocation5], %s3855_s16  ;;  %s4028_s22 = scalar_lea.vmem [#allocation6], %s3689_s9 }
 0x1c2   : > { %2579 = dma.vmem_to_hbm [thread:$0]  (%p2901_p3), %s3866_s13, 16, %s3864_s21, %s4027_s0   ;;  %1998 = vst.msk [vmem:[%s4028_s22] sm:$0x1] %vm1943_vm8, %v1997_v46 }
 0x1c3   : > { %s2714_s12 = scalar_lea.vmem %s3874_s8, 16  ;;  %s2817_s15 = smov [#allocation6]  }
 0x1c4   : > { %p2715_p11 = scmp.ne.s32.totalorder %s3874_s8, %s2714_s12  ;;  %s2718_s17 = sshll.u32 %s2817_s15, 4  ;;  %s2719_s17 = int_to_ptr.vmem [resolvable:$false] %s2718_s17 }
 0x1c5   : > { %s2720_s14 = scalar_lea.vmem %s2719_s17, 32  ;;  %p2721_p0 = scmp.lt.s32.totalorder %s3874_s8, %s2719_s17 }
 0x1c6   : > { %p2716_p12 = pnand %p2715_p11, %p2901_p3  ;;  %p2722_p1 = scmp.lt.s32.totalorder %s2720_s14, %s2714_s12 }
 0x1c8   : > { %p2717_p13 = pneg %p2716_p12  ;;  %p2723_p2 = por %p2722_p1, %p2721_p0 }
 0x1ca   : > { %p2724_p4 = pnand %p2723_p2, %p2717_p13 }
 0x1cc   : > { %2727 = shalt.err (!%p2724_p4)
}
 0x1cd   : > { %s2728_s9 = scalar_lea.hbm %s3872_s27, 16  ;;  %s2732_s10 = scalar_lea.hbm %s3959_s5, 64 }
 0x1ce   : > { %p2729_p5 = scmp.ne.s32.totalorder %s3872_s27, %s2728_s9  ;;  %p2733_p9 = scmp.lt.s32.totalorder %s3872_s27, %s3959_s5 }
 0x1cf   : > { %p2734_p10 = scmp.lt.s32.totalorder %s2732_s10, %s2728_s9 }
 0x1d0   : > { %p2730_p6 = pnand %p2729_p5, %p2901_p3 }
 0x1d1   : > { %p2735_p11 = por %p2734_p10, %p2733_p9 }
 0x1d2   : > { %p2731_p7 = pneg %p2730_p6 }
 0x1d4   : > { %p2736_p12 = pnand %p2735_p11, %p2731_p7 }
 0x1d6   : > { %2739 = shalt.err (!%p2736_p12)
}
 0x1d7   : > { %2580 = dma.vmem_to_hbm [thread:$0]  (%p2901_p3), %s3874_s8, 16, %s3872_s27, %s4027_s0  }
 0x1d8 PF: > { %p2594_p13 = scmp.ge.s32.totalorder %s2810_s25, 2  ;;  %s2069_s22 = sand.u32 1, %s2782_s18  }
 0x1d9   : > { %s2070_s12 = scalar_lea.sflag [#allocation3], %s2069_s22 }
 0x1da   : > { %p2585_p0 = pnand %p2594_p13, %p2912_p8 }
 0x1dc   : > { %p2586_p1 = pneg %p2585_p0 }
 0x1de   : > { %2773 = dma.done.wait (%p2586_p1), %s2070_s12, 1024  }
 0x1df   : > { %2775 = vsyncadd (%p2586_p1), %s2070_s12, 4294966272  ;;  %s4029_s15 = sadd.s32 4294967294, %s2810_s25  }
 0x1e0   : > { %s2078_s6 = sand.u32 1, %s4029_s15  }
 0x1e1   : > { %s2079_s17 = scalar_lea.sflag [#allocation5], %s2078_s6 }
 0x1e2   : > { %2777 = dma.done.wait (%p2586_p1), %s2079_s17, 32  }
 0x1e3   : > { %2779 = vsyncadd (%p2586_p1), %s2079_s17, 4294967264  ;;  %s22_s25 = sadd.s32 1, %s2810_s25   ;;  %s4030_s18 = smov %s2786_s19 }
 0x1e4   : > { %p19_p3 = scmp.ge.s32.totalorder %s22_s25, 6   ;;  %s4031_s19 = smov %s2790_s20 }
 0x1e5   : > { %s4032_s20 = smov %s2921_s11  ;;  %s4033_s21 = smov %s2802_s23 }
 0x1e6   : > { %s4034_s22 = smov %s2806_s24  ;;  %s4035_s23 = smov %s4038_s28 }
 0x1e7   : > { %s4036_s24 = smov %s4042_s29  ;;  %21 = sbr.rel (!%p19_p3) target bundleno = 9 (0x9), region = 110 }
 0x1ec   :  { %2091 = vsyncpa [#allocation3], 1 }
 0x1ed   :  { %2093 = vsyncpa [#allocation3 + $0x1], 1 }
 0x1ee   :  { %2094 = vsyncpa [#allocation5], 1 }
 0x1ef   :  { %2096 = vsyncpa [#allocation5 + $0x1], 1 }

</bundles_post_ra>
